<compile_context>
chip_gen: v7x
topology: tpu7x:2x2x1
jax: 0.10.0
libtpu: 0.0.40
codegen_flags: <defaults>
</compile_context>

<pallas_src>
import functools
import math

import jax
import jax.numpy as jnp
from jax.experimental import pallas as pl
from jax.experimental.pallas import tpu as pltpu


# --------------------------------------------------------------------------- #
# Kernel: gather one block of embedding rows from HBM (pipelined), scale, store
# --------------------------------------------------------------------------- #
def _embed_kernel(ids_ref, table_ref, o_ref, gather_buf, sems, *,
                  tokens_per_block, num_tokens, scale):
    # ids_ref    : SMEM (num_tokens,) int32           scalar-prefetched token ids
    # table_ref  : HBM  (vocab, d_model)              raw ref (memory_space=pl.ANY)
    # o_ref      : VMEM (tokens_per_block, d_model)   output block
    # gather_buf : VMEM (2, tokens_per_block, d_model) 2-slot gather scratch
    # sems       : DMA semaphores, one per slot (shared by that slot's row copies)
    i = pl.program_id(0)
    nblocks = pl.num_programs(0)
    tpb = tokens_per_block
    last = num_tokens - 1

    def issue_block(block_idx, slot):
        # All scalar id reads and DMA .start()s happen before any .wait() in
        # this grid step (keeps the scalar slots fed; waits break sst->sld fwd).
        base = block_idx * tpb
        for t in range(tpb):                           # static unroll, small
            idx = jnp.minimum(base + t, last)          # clamp tail of last block
            row = ids_ref[idx]                         # dynamic scalar from SMEM
            pltpu.make_async_copy(table_ref.at[row],
                                  gather_buf.at[slot, t],
                                  sems.at[slot]).start()

    slot = i % 2

    # Prime slot 0 with block 0 on the first grid step.
    @pl.when(i == 0)
    def _():
        issue_block(0, 0)

    # Prefetch the NEXT block's rows into the other slot before waiting on the
    # current block, so its DMAs overlap the wait/compute/writeback of block i.
    @pl.when(i + 1 < nblocks)
    def _():
        issue_block(i + 1, 1 - slot)

    # Wait for the current block's row copies (per-copy waits on the shared
    # slot semaphore; descriptor shapes match the issued copies).
    for t in range(tpb):
        pltpu.make_async_copy(table_ref.at[0],
                              gather_buf.at[slot, t],
                              sems.at[slot]).wait()

    # Single full-tile VPU multiply in the table's native dtype (bf16-friendly).
    o_ref[...] = gather_buf[slot] * jnp.asarray(scale, dtype=o_ref.dtype)


# --------------------------------------------------------------------------- #
# Wrapper: InputEmbeddings.forward
# --------------------------------------------------------------------------- #
def input_embeddings(ids, table, *, tokens_per_block=256):
    """ids: int array of any shape (e.g. (batch, seq)); table: (vocab, d_model).

    Returns embedding(ids) * sqrt(d_model) with shape ids.shape + (d_model,).
    """
    vocab, d_model = table.shape
    orig_shape = ids.shape
    ids_flat = ids.reshape(-1).astype(jnp.int32)
    num_tokens = ids_flat.shape[0]

    # Token block: multiple of 8 (sublane alignment of the output block), big
    # enough to amortize per-grid-step overhead, bounded by the VMEM budget.
    tpb = max(8, (min(tokens_per_block, num_tokens) // 8) * 8)
    grid = (pl.cdiv(num_tokens, tpb),)

    scale = math.sqrt(float(d_model))

    # Resident VMEM ~= 2 double-buffered output blocks + 2 gather slots.
    block_bytes = tpb * d_model * jnp.dtype(table.dtype).itemsize
    vmem_bytes = int(min(96 * 1024 * 1024, max(32 * 1024 * 1024, 6 * block_bytes)))

    out = pl.pallas_call(
        functools.partial(_embed_kernel, tokens_per_block=tpb,
                          num_tokens=num_tokens, scale=scale),
        out_shape=jax.ShapeDtypeStruct((num_tokens, d_model), table.dtype),
        grid_spec=pltpu.PrefetchScalarGridSpec(
            num_scalar_prefetch=1,                         # token ids -> SMEM
            grid=grid,
            in_specs=[pl.BlockSpec(memory_space=pl.ANY)],   # table stays in HBM
            out_specs=pl.BlockSpec((tpb, d_model), lambda i, ids: (i, 0)),
            scratch_shapes=[
                pltpu.VMEM((2, tpb, d_model), table.dtype),  # 2-slot gather buf
                pltpu.SemaphoreType.DMA((2,)),               # one sem per slot
            ],
        ),
        # Cross-block prefetch relies on sequential grid order -> "arbitrary".
        compiler_params=pltpu.CompilerParams(
            dimension_semantics=("arbitrary",),
            vmem_limit_bytes=vmem_bytes,
        ),
    )(ids_flat, table)

    return out.reshape(*orig_shape, d_model)


if __name__ == "__main__":
    # Shapes implied by InputEmbeddings.forward: x = (batch, seq) int ids,
    # output = (batch, seq, d_model).  d_model = 128 (lane-dense).
    B, S, D, V = 2, 8, 128, 1000

    key = jax.random.PRNGKey(0)
    k_ids, k_tab = jax.random.split(key)
    ids = jax.random.randint(k_ids, (B, S), 0, V, dtype=jnp.int32)
    table = jax.random.normal(k_tab, (V, D), jnp.float32)   # nn.Embedding weight

    # Small block so the demo exercises the 2-deep cross-block gather pipeline
    # (grid of 2 blocks).
    out = jax.block_until_ready(input_embeddings(ids, table, tokens_per_block=8))
    ref = jnp.take(table, ids, axis=0) * math.sqrt(D)
    assert out.shape == (B, S, D)
    assert out.dtype == table.dtype
    assert jnp.allclose(out, ref, atol=1e-5, rtol=1e-5), "Pallas embedding mismatch"

    # Ragged case: num_tokens not a multiple of the token block (no wrapper
    # pad/slice; tail handled by in-kernel id clamping + masked writeback).
    ids2 = jax.random.randint(k_ids, (3, 3), 0, V, dtype=jnp.int32)   # 9 tokens
    out2 = jax.block_until_ready(input_embeddings(ids2, table, tokens_per_block=8))
    ref2 = jnp.take(table, ids2, axis=0) * math.sqrt(D)
    assert out2.shape == (3, 3, D)
    assert jnp.allclose(out2, ref2, atol=1e-5, rtol=1e-5), "ragged tail mismatch"

    print("KERNEL_OK")
</pallas_src>

<mosaic_0001>
module attributes {stable_mosaic.version = 11 : i64} {
  func.func @_embed_kernel(%arg0: i32, %arg1: memref<16xi32, #tpu.memory_space<smem>>, %arg2: memref<1000x128xf32, #tpu.memory_space<any>>, %arg3: memref<8x128xf32, #tpu.memory_space<vmem>>, %arg4: memref<2x8x128xf32, #tpu.memory_space<vmem>>, %arg5: memref<2x!tpu.dma_semaphore, #tpu.memory_space<semaphore_mem>>) attributes {dimension_semantics = [#tpu.dimension_semantics<arbitrary>], iteration_bounds = array<i64: 2>, scalar_prefetch = 1 : i64, scratch_operands = 2 : i64, tpu.core_type = #tpu.core_type<tc>, window_params = [{}, {transform_indices = @transform_1, window_bounds = array<i64: 8, 128>}]} {
    %c2_i32 = arith.constant 2 : i32
    %c0_i32 = arith.constant 0 : i32
    %0 = arith.cmpi eq, %c2_i32, %c0_i32 : i32
    %c1_i32 = arith.constant 1 : i32
    %1 = arith.select %0, %c1_i32, %c2_i32 : i32
    %2 = arith.remsi %arg0, %1 : i32
    %c0_i32_0 = arith.constant 0 : i32
    %3 = arith.cmpi ne, %2, %c0_i32_0 : i32
    %c0_i32_1 = arith.constant 0 : i32
    %4 = arith.cmpi slt, %2, %c0_i32_1 : i32
    %c0_i32_2 = arith.constant 0 : i32
    %5 = arith.cmpi slt, %1, %c0_i32_2 : i32
    %6 = arith.xori %4, %5 : i1
    %7 = arith.andi %6, %3 : i1
    %8 = arith.addi %2, %1 : i32
    %9 = arith.select %7, %8, %2 : i32
    %c0_i32_3 = arith.constant 0 : i32
    %10 = arith.cmpi eq, %arg0, %c0_i32_3 : i32
    %11 = arith.extui %10 : i1 to i32
    %c0_i32_4 = arith.constant 0 : i32
    %12 = arith.cmpi ne, %11, %c0_i32_4 : i32
    scf.if %12 {
      %c0_i32_38 = arith.constant 0 : i32
      %c15_i32 = arith.constant 15 : i32
      %71 = arith.minsi %c0_i32_38, %c15_i32 : i32
      %72 = arith.index_cast %71 : i32 to index
      %73 = memref.load %arg1[%72] : memref<16xi32, #tpu.memory_space<smem>>
      %c0_i32_39 = arith.constant 0 : i32
      %c0_i32_40 = arith.constant 0 : i32
      %c0_i32_41 = arith.constant 0 : i32
      %c0_i32_42 = arith.constant 0 : i32
      %74 = tpu.memref_slice %arg2[%73, %c0_i32_42] : memref<1000x128xf32, #tpu.memory_space<any>> -> memref<1x128xf32, #tpu.memory_space<any>>
      %75 = tpu.memref_squeeze %74 : memref<1x128xf32, #tpu.memory_space<any>> -> memref<128xf32, #tpu.memory_space<any>>
      %c0_i32_43 = arith.constant 0 : i32
      %76 = tpu.memref_slice %arg4[%c0_i32_39, %c0_i32_40, %c0_i32_43] : memref<2x8x128xf32, #tpu.memory_space<vmem>> -> memref<1x1x128xf32, #tpu.memory_space<vmem>>
      %77 = tpu.memref_squeeze %76 : memref<1x1x128xf32, #tpu.memory_space<vmem>> -> memref<128xf32, #tpu.memory_space<vmem>>
      %78 = tpu.memref_slice %arg5[%c0_i32_41] : memref<2x!tpu.dma_semaphore, #tpu.memory_space<semaphore_mem>> -> memref<1x!tpu.dma_semaphore, #tpu.memory_space<semaphore_mem>>
      %79 = tpu.memref_squeeze %78 : memref<1x!tpu.dma_semaphore, #tpu.memory_space<semaphore_mem>> -> memref<!tpu.dma_semaphore, #tpu.memory_space<semaphore_mem>>
      tpu.enqueue_dma source(%75 : memref<128xf32, #tpu.memory_space<any>>) target(%77 : memref<128xf32, #tpu.memory_space<vmem>>) target_semaphore(%79 : memref<!tpu.dma_semaphore, #tpu.memory_space<semaphore_mem>>)
      %c1_i32_44 = arith.constant 1 : i32
      %c15_i32_45 = arith.constant 15 : i32
      %80 = arith.minsi %c1_i32_44, %c15_i32_45 : i32
      %81 = arith.index_cast %80 : i32 to index
      %82 = memref.load %arg1[%81] : memref<16xi32, #tpu.memory_space<smem>>
      %c0_i32_46 = arith.constant 0 : i32
      %c1_i32_47 = arith.constant 1 : i32
      %c0_i32_48 = arith.constant 0 : i32
      %c0_i32_49 = arith.constant 0 : i32
      %83 = tpu.memref_slice %arg2[%82, %c0_i32_49] : memref<1000x128xf32, #tpu.memory_space<any>> -> memref<1x128xf32, #tpu.memory_space<any>>
      %84 = tpu.memref_squeeze %83 : memref<1x128xf32, #tpu.memory_space<any>> -> memref<128xf32, #tpu.memory_space<any>>
      %c0_i32_50 = arith.constant 0 : i32
      %85 = tpu.memref_slice %arg4[%c0_i32_46, %c1_i32_47, %c0_i32_50] : memref<2x8x128xf32, #tpu.memory_space<vmem>> -> memref<1x1x128xf32, #tpu.memory_space<vmem>>
      %86 = tpu.memref_squeeze %85 : memref<1x1x128xf32, #tpu.memory_space<vmem>> -> memref<128xf32, #tpu.memory_space<vmem>>
      %87 = tpu.memref_slice %arg5[%c0_i32_48] : memref<2x!tpu.dma_semaphore, #tpu.memory_space<semaphore_mem>> -> memref<1x!tpu.dma_semaphore, #tpu.memory_space<semaphore_mem>>
      %88 = tpu.memref_squeeze %87 : memref<1x!tpu.dma_semaphore, #tpu.memory_space<semaphore_mem>> -> memref<!tpu.dma_semaphore, #tpu.memory_space<semaphore_mem>>
      tpu.enqueue_dma source(%84 : memref<128xf32, #tpu.memory_space<any>>) target(%86 : memref<128xf32, #tpu.memory_space<vmem>>) target_semaphore(%88 : memref<!tpu.dma_semaphore, #tpu.memory_space<semaphore_mem>>)
      %c2_i32_51 = arith.constant 2 : i32
      %c15_i32_52 = arith.constant 15 : i32
      %89 = arith.minsi %c2_i32_51, %c15_i32_52 : i32
      %90 = arith.index_cast %89 : i32 to index
      %91 = memref.load %arg1[%90] : memref<16xi32, #tpu.memory_space<smem>>
      %c0_i32_53 = arith.constant 0 : i32
      %c2_i32_54 = arith.constant 2 : i32
      %c0_i32_55 = arith.constant 0 : i32
      %c0_i32_56 = arith.constant 0 : i32
      %92 = tpu.memref_slice %arg2[%91, %c0_i32_56] : memref<1000x128xf32, #tpu.memory_space<any>> -> memref<1x128xf32, #tpu.memory_space<any>>
      %93 = tpu.memref_squeeze %92 : memref<1x128xf32, #tpu.memory_space<any>> -> memref<128xf32, #tpu.memory_space<any>>
      %c0_i32_57 = arith.constant 0 : i32
      %94 = tpu.memref_slice %arg4[%c0_i32_53, %c2_i32_54, %c0_i32_57] : memref<2x8x128xf32, #tpu.memory_space<vmem>> -> memref<1x1x128xf32, #tpu.memory_space<vmem>>
      %95 = tpu.memref_squeeze %94 : memref<1x1x128xf32, #tpu.memory_space<vmem>> -> memref<128xf32, #tpu.memory_space<vmem>>
      %96 = tpu.memref_slice %arg5[%c0_i32_55] : memref<2x!tpu.dma_semaphore, #tpu.memory_space<semaphore_mem>> -> memref<1x!tpu.dma_semaphore, #tpu.memory_space<semaphore_mem>>
      %97 = tpu.memref_squeeze %96 : memref<1x!tpu.dma_semaphore, #tpu.memory_space<semaphore_mem>> -> memref<!tpu.dma_semaphore, #tpu.memory_space<semaphore_mem>>
      tpu.enqueue_dma source(%93 : memref<128xf32, #tpu.memory_space<any>>) target(%95 : memref<128xf32, #tpu.memory_space<vmem>>) target_semaphore(%97 : memref<!tpu.dma_semaphore, #tpu.memory_space<semaphore_mem>>)
      %c3_i32_58 = arith.constant 3 : i32
      %c15_i32_59 = arith.constant 15 : i32
      %98 = arith.minsi %c3_i32_58, %c15_i32_59 : i32
      %99 = arith.index_cast %98 : i32 to index
      %100 = memref.load %arg1[%99] : memref<16xi32, #tpu.memory_space<smem>>
      %c0_i32_60 = arith.constant 0 : i32
      %c3_i32_61 = arith.constant 3 : i32
      %c0_i32_62 = arith.constant 0 : i32
      %c0_i32_63 = arith.constant 0 : i32
      %101 = tpu.memref_slice %arg2[%100, %c0_i32_63] : memref<1000x128xf32, #tpu.memory_space<any>> -> memref<1x128xf32, #tpu.memory_space<any>>
      %102 = tpu.memref_squeeze %101 : memref<1x128xf32, #tpu.memory_space<any>> -> memref<128xf32, #tpu.memory_space<any>>
      %c0_i32_64 = arith.constant 0 : i32
      %103 = tpu.memref_slice %arg4[%c0_i32_60, %c3_i32_61, %c0_i32_64] : memref<2x8x128xf32, #tpu.memory_space<vmem>> -> memref<1x1x128xf32, #tpu.memory_space<vmem>>
      %104 = tpu.memref_squeeze %103 : memref<1x1x128xf32, #tpu.memory_space<vmem>> -> memref<128xf32, #tpu.memory_space<vmem>>
      %105 = tpu.memref_slice %arg5[%c0_i32_62] : memref<2x!tpu.dma_semaphore, #tpu.memory_space<semaphore_mem>> -> memref<1x!tpu.dma_semaphore, #tpu.memory_space<semaphore_mem>>
      %106 = tpu.memref_squeeze %105 : memref<1x!tpu.dma_semaphore, #tpu.memory_space<semaphore_mem>> -> memref<!tpu.dma_semaphore, #tpu.memory_space<semaphore_mem>>
      tpu.enqueue_dma source(%102 : memref<128xf32, #tpu.memory_space<any>>) target(%104 : memref<128xf32, #tpu.memory_space<vmem>>) target_semaphore(%106 : memref<!tpu.dma_semaphore, #tpu.memory_space<semaphore_mem>>)
      %c4_i32_65 = arith.constant 4 : i32
      %c15_i32_66 = arith.constant 15 : i32
      %107 = arith.minsi %c4_i32_65, %c15_i32_66 : i32
      %108 = arith.index_cast %107 : i32 to index
      %109 = memref.load %arg1[%108] : memref<16xi32, #tpu.memory_space<smem>>
      %c0_i32_67 = arith.constant 0 : i32
      %c4_i32_68 = arith.constant 4 : i32
      %c0_i32_69 = arith.constant 0 : i32
      %c0_i32_70 = arith.constant 0 : i32
      %110 = tpu.memref_slice %arg2[%109, %c0_i32_70] : memref<1000x128xf32, #tpu.memory_space<any>> -> memref<1x128xf32, #tpu.memory_space<any>>
      %111 = tpu.memref_squeeze %110 : memref<1x128xf32, #tpu.memory_space<any>> -> memref<128xf32, #tpu.memory_space<any>>
      %c0_i32_71 = arith.constant 0 : i32
      %112 = tpu.memref_slice %arg4[%c0_i32_67, %c4_i32_68, %c0_i32_71] : memref<2x8x128xf32, #tpu.memory_space<vmem>> -> memref<1x1x128xf32, #tpu.memory_space<vmem>>
      %113 = tpu.memref_squeeze %112 : memref<1x1x128xf32, #tpu.memory_space<vmem>> -> memref<128xf32, #tpu.memory_space<vmem>>
      %114 = tpu.memref_slice %arg5[%c0_i32_69] : memref<2x!tpu.dma_semaphore, #tpu.memory_space<semaphore_mem>> -> memref<1x!tpu.dma_semaphore, #tpu.memory_space<semaphore_mem>>
      %115 = tpu.memref_squeeze %114 : memref<1x!tpu.dma_semaphore, #tpu.memory_space<semaphore_mem>> -> memref<!tpu.dma_semaphore, #tpu.memory_space<semaphore_mem>>
      tpu.enqueue_dma source(%111 : memref<128xf32, #tpu.memory_space<any>>) target(%113 : memref<128xf32, #tpu.memory_space<vmem>>) target_semaphore(%115 : memref<!tpu.dma_semaphore, #tpu.memory_space<semaphore_mem>>)
      %c5_i32_72 = arith.constant 5 : i32
      %c15_i32_73 = arith.constant 15 : i32
      %116 = arith.minsi %c5_i32_72, %c15_i32_73 : i32
      %117 = arith.index_cast %116 : i32 to index
      %118 = memref.load %arg1[%117] : memref<16xi32, #tpu.memory_space<smem>>
      %c0_i32_74 = arith.constant 0 : i32
      %c5_i32_75 = arith.constant 5 : i32
      %c0_i32_76 = arith.constant 0 : i32
      %c0_i32_77 = arith.constant 0 : i32
      %119 = tpu.memref_slice %arg2[%118, %c0_i32_77] : memref<1000x128xf32, #tpu.memory_space<any>> -> memref<1x128xf32, #tpu.memory_space<any>>
      %120 = tpu.memref_squeeze %119 : memref<1x128xf32, #tpu.memory_space<any>> -> memref<128xf32, #tpu.memory_space<any>>
      %c0_i32_78 = arith.constant 0 : i32
      %121 = tpu.memref_slice %arg4[%c0_i32_74, %c5_i32_75, %c0_i32_78] : memref<2x8x128xf32, #tpu.memory_space<vmem>> -> memref<1x1x128xf32, #tpu.memory_space<vmem>>
      %122 = tpu.memref_squeeze %121 : memref<1x1x128xf32, #tpu.memory_space<vmem>> -> memref<128xf32, #tpu.memory_space<vmem>>
      %123 = tpu.memref_slice %arg5[%c0_i32_76] : memref<2x!tpu.dma_semaphore, #tpu.memory_space<semaphore_mem>> -> memref<1x!tpu.dma_semaphore, #tpu.memory_space<semaphore_mem>>
      %124 = tpu.memref_squeeze %123 : memref<1x!tpu.dma_semaphore, #tpu.memory_space<semaphore_mem>> -> memref<!tpu.dma_semaphore, #tpu.memory_space<semaphore_mem>>
      tpu.enqueue_dma source(%120 : memref<128xf32, #tpu.memory_space<any>>) target(%122 : memref<128xf32, #tpu.memory_space<vmem>>) target_semaphore(%124 : memref<!tpu.dma_semaphore, #tpu.memory_space<semaphore_mem>>)
      %c6_i32_79 = arith.constant 6 : i32
      %c15_i32_80 = arith.constant 15 : i32
      %125 = arith.minsi %c6_i32_79, %c15_i32_80 : i32
      %126 = arith.index_cast %125 : i32 to index
      %127 = memref.load %arg1[%126] : memref<16xi32, #tpu.memory_space<smem>>
      %c0_i32_81 = arith.constant 0 : i32
      %c6_i32_82 = arith.constant 6 : i32
      %c0_i32_83 = arith.constant 0 : i32
      %c0_i32_84 = arith.constant 0 : i32
      %128 = tpu.memref_slice %arg2[%127, %c0_i32_84] : memref<1000x128xf32, #tpu.memory_space<any>> -> memref<1x128xf32, #tpu.memory_space<any>>
      %129 = tpu.memref_squeeze %128 : memref<1x128xf32, #tpu.memory_space<any>> -> memref<128xf32, #tpu.memory_space<any>>
      %c0_i32_85 = arith.constant 0 : i32
      %130 = tpu.memref_slice %arg4[%c0_i32_81, %c6_i32_82, %c0_i32_85] : memref<2x8x128xf32, #tpu.memory_space<vmem>> -> memref<1x1x128xf32, #tpu.memory_space<vmem>>
      %131 = tpu.memref_squeeze %130 : memref<1x1x128xf32, #tpu.memory_space<vmem>> -> memref<128xf32, #tpu.memory_space<vmem>>
      %132 = tpu.memref_slice %arg5[%c0_i32_83] : memref<2x!tpu.dma_semaphore, #tpu.memory_space<semaphore_mem>> -> memref<1x!tpu.dma_semaphore, #tpu.memory_space<semaphore_mem>>
      %133 = tpu.memref_squeeze %132 : memref<1x!tpu.dma_semaphore, #tpu.memory_space<semaphore_mem>> -> memref<!tpu.dma_semaphore, #tpu.memory_space<semaphore_mem>>
      tpu.enqueue_dma source(%129 : memref<128xf32, #tpu.memory_space<any>>) target(%131 : memref<128xf32, #tpu.memory_space<vmem>>) target_semaphore(%133 : memref<!tpu.dma_semaphore, #tpu.memory_space<semaphore_mem>>)
      %c7_i32_86 = arith.constant 7 : i32
      %c15_i32_87 = arith.constant 15 : i32
      %134 = arith.minsi %c7_i32_86, %c15_i32_87 : i32
      %135 = arith.index_cast %134 : i32 to index
      %136 = memref.load %arg1[%135] : memref<16xi32, #tpu.memory_space<smem>>
      %c0_i32_88 = arith.constant 0 : i32
      %c7_i32_89 = arith.constant 7 : i32
      %c0_i32_90 = arith.constant 0 : i32
      %c0_i32_91 = arith.constant 0 : i32
      %137 = tpu.memref_slice %arg2[%136, %c0_i32_91] : memref<1000x128xf32, #tpu.memory_space<any>> -> memref<1x128xf32, #tpu.memory_space<any>>
      %138 = tpu.memref_squeeze %137 : memref<1x128xf32, #tpu.memory_space<any>> -> memref<128xf32, #tpu.memory_space<any>>
      %c0_i32_92 = arith.constant 0 : i32
      %139 = tpu.memref_slice %arg4[%c0_i32_88, %c7_i32_89, %c0_i32_92] : memref<2x8x128xf32, #tpu.memory_space<vmem>> -> memref<1x1x128xf32, #tpu.memory_space<vmem>>
      %140 = tpu.memref_squeeze %139 : memref<1x1x128xf32, #tpu.memory_space<vmem>> -> memref<128xf32, #tpu.memory_space<vmem>>
      %141 = tpu.memref_slice %arg5[%c0_i32_90] : memref<2x!tpu.dma_semaphore, #tpu.memory_space<semaphore_mem>> -> memref<1x!tpu.dma_semaphore, #tpu.memory_space<semaphore_mem>>
      %142 = tpu.memref_squeeze %141 : memref<1x!tpu.dma_semaphore, #tpu.memory_space<semaphore_mem>> -> memref<!tpu.dma_semaphore, #tpu.memory_space<semaphore_mem>>
      tpu.enqueue_dma source(%138 : memref<128xf32, #tpu.memory_space<any>>) target(%140 : memref<128xf32, #tpu.memory_space<vmem>>) target_semaphore(%142 : memref<!tpu.dma_semaphore, #tpu.memory_space<semaphore_mem>>)
    } else {
    }
    %c1_i32_5 = arith.constant 1 : i32
    %13 = arith.addi %arg0, %c1_i32_5 : i32
    %c2_i32_6 = arith.constant 2 : i32
    %14 = arith.cmpi slt, %13, %c2_i32_6 : i32
    %15 = arith.extui %14 : i1 to i32
    %c0_i32_7 = arith.constant 0 : i32
    %16 = arith.cmpi ne, %15, %c0_i32_7 : i32
    scf.if %16 {
      %c1_i32_38 = arith.constant 1 : i32
      %71 = arith.addi %arg0, %c1_i32_38 : i32
      %c1_i32_39 = arith.constant 1 : i32
      %72 = arith.subi %c1_i32_39, %9 : i32
      %c8_i32 = arith.constant 8 : i32
      %73 = arith.muli %71, %c8_i32 : i32
      %c0_i32_40 = arith.constant 0 : i32
      %74 = arith.addi %73, %c0_i32_40 : i32
      %c15_i32 = arith.constant 15 : i32
      %75 = arith.minsi %74, %c15_i32 : i32
      %76 = arith.index_cast %75 : i32 to index
      %77 = memref.load %arg1[%76] : memref<16xi32, #tpu.memory_space<smem>>
      %c0_i32_41 = arith.constant 0 : i32
      %c0_i32_42 = arith.constant 0 : i32
      %78 = tpu.memref_slice %arg2[%77, %c0_i32_42] : memref<1000x128xf32, #tpu.memory_space<any>> -> memref<1x128xf32, #tpu.memory_space<any>>
      %79 = tpu.memref_squeeze %78 : memref<1x128xf32, #tpu.memory_space<any>> -> memref<128xf32, #tpu.memory_space<any>>
      %c0_i32_43 = arith.constant 0 : i32
      %80 = tpu.memref_slice %arg4[%72, %c0_i32_41, %c0_i32_43] : memref<2x8x128xf32, #tpu.memory_space<vmem>> -> memref<1x1x128xf32, #tpu.memory_space<vmem>>
      %81 = tpu.memref_squeeze %80 : memref<1x1x128xf32, #tpu.memory_space<vmem>> -> memref<128xf32, #tpu.memory_space<vmem>>
      %82 = tpu.memref_slice %arg5[%72] : memref<2x!tpu.dma_semaphore, #tpu.memory_space<semaphore_mem>> -> memref<1x!tpu.dma_semaphore, #tpu.memory_space<semaphore_mem>>
      %83 = tpu.memref_squeeze %82 : memref<1x!tpu.dma_semaphore, #tpu.memory_space<semaphore_mem>> -> memref<!tpu.dma_semaphore, #tpu.memory_space<semaphore_mem>>
      tpu.enqueue_dma source(%79 : memref<128xf32, #tpu.memory_space<any>>) target(%81 : memref<128xf32, #tpu.memory_space<vmem>>) target_semaphore(%83 : memref<!tpu.dma_semaphore, #tpu.memory_space<semaphore_mem>>)
      %c1_i32_44 = arith.constant 1 : i32
      %84 = arith.addi %73, %c1_i32_44 : i32
      %c15_i32_45 = arith.constant 15 : i32
      %85 = arith.minsi %84, %c15_i32_45 : i32
      %86 = arith.index_cast %85 : i32 to index
      %87 = memref.load %arg1[%86] : memref<16xi32, #tpu.memory_space<smem>>
      %c1_i32_46 = arith.constant 1 : i32
      %c0_i32_47 = arith.constant 0 : i32
      %88 = tpu.memref_slice %arg2[%87, %c0_i32_47] : memref<1000x128xf32, #tpu.memory_space<any>> -> memref<1x128xf32, #tpu.memory_space<any>>
      %89 = tpu.memref_squeeze %88 : memref<1x128xf32, #tpu.memory_space<any>> -> memref<128xf32, #tpu.memory_space<any>>
      %c0_i32_48 = arith.constant 0 : i32
      %90 = tpu.memref_slice %arg4[%72, %c1_i32_46, %c0_i32_48] : memref<2x8x128xf32, #tpu.memory_space<vmem>> -> memref<1x1x128xf32, #tpu.memory_space<vmem>>
      %91 = tpu.memref_squeeze %90 : memref<1x1x128xf32, #tpu.memory_space<vmem>> -> memref<128xf32, #tpu.memory_space<vmem>>
      %92 = tpu.memref_slice %arg5[%72] : memref<2x!tpu.dma_semaphore, #tpu.memory_space<semaphore_mem>> -> memref<1x!tpu.dma_semaphore, #tpu.memory_space<semaphore_mem>>
      %93 = tpu.memref_squeeze %92 : memref<1x!tpu.dma_semaphore, #tpu.memory_space<semaphore_mem>> -> memref<!tpu.dma_semaphore, #tpu.memory_space<semaphore_mem>>
      tpu.enqueue_dma source(%89 : memref<128xf32, #tpu.memory_space<any>>) target(%91 : memref<128xf32, #tpu.memory_space<vmem>>) target_semaphore(%93 : memref<!tpu.dma_semaphore, #tpu.memory_space<semaphore_mem>>)
      %c2_i32_49 = arith.constant 2 : i32
      %94 = arith.addi %73, %c2_i32_49 : i32
      %c15_i32_50 = arith.constant 15 : i32
      %95 = arith.minsi %94, %c15_i32_50 : i32
      %96 = arith.index_cast %95 : i32 to index
      %97 = memref.load %arg1[%96] : memref<16xi32, #tpu.memory_space<smem>>
      %c2_i32_51 = arith.constant 2 : i32
      %c0_i32_52 = arith.constant 0 : i32
      %98 = tpu.memref_slice %arg2[%97, %c0_i32_52] : memref<1000x128xf32, #tpu.memory_space<any>> -> memref<1x128xf32, #tpu.memory_space<any>>
      %99 = tpu.memref_squeeze %98 : memref<1x128xf32, #tpu.memory_space<any>> -> memref<128xf32, #tpu.memory_space<any>>
      %c0_i32_53 = arith.constant 0 : i32
      %100 = tpu.memref_slice %arg4[%72, %c2_i32_51, %c0_i32_53] : memref<2x8x128xf32, #tpu.memory_space<vmem>> -> memref<1x1x128xf32, #tpu.memory_space<vmem>>
      %101 = tpu.memref_squeeze %100 : memref<1x1x128xf32, #tpu.memory_space<vmem>> -> memref<128xf32, #tpu.memory_space<vmem>>
      %102 = tpu.memref_slice %arg5[%72] : memref<2x!tpu.dma_semaphore, #tpu.memory_space<semaphore_mem>> -> memref<1x!tpu.dma_semaphore, #tpu.memory_space<semaphore_mem>>
      %103 = tpu.memref_squeeze %102 : memref<1x!tpu.dma_semaphore, #tpu.memory_space<semaphore_mem>> -> memref<!tpu.dma_semaphore, #tpu.memory_space<semaphore_mem>>
      tpu.enqueue_dma source(%99 : memref<128xf32, #tpu.memory_space<any>>) target(%101 : memref<128xf32, #tpu.memory_space<vmem>>) target_semaphore(%103 : memref<!tpu.dma_semaphore, #tpu.memory_space<semaphore_mem>>)
      %c3_i32_54 = arith.constant 3 : i32
      %104 = arith.addi %73, %c3_i32_54 : i32
      %c15_i32_55 = arith.constant 15 : i32
      %105 = arith.minsi %104, %c15_i32_55 : i32
      %106 = arith.index_cast %105 : i32 to index
      %107 = memref.load %arg1[%106] : memref<16xi32, #tpu.memory_space<smem>>
      %c3_i32_56 = arith.constant 3 : i32
      %c0_i32_57 = arith.constant 0 : i32
      %108 = tpu.memref_slice %arg2[%107, %c0_i32_57] : memref<1000x128xf32, #tpu.memory_space<any>> -> memref<1x128xf32, #tpu.memory_space<any>>
      %109 = tpu.memref_squeeze %108 : memref<1x128xf32, #tpu.memory_space<any>> -> memref<128xf32, #tpu.memory_space<any>>
      %c0_i32_58 = arith.constant 0 : i32
      %110 = tpu.memref_slice %arg4[%72, %c3_i32_56, %c0_i32_58] : memref<2x8x128xf32, #tpu.memory_space<vmem>> -> memref<1x1x128xf32, #tpu.memory_space<vmem>>
      %111 = tpu.memref_squeeze %110 : memref<1x1x128xf32, #tpu.memory_space<vmem>> -> memref<128xf32, #tpu.memory_space<vmem>>
      %112 = tpu.memref_slice %arg5[%72] : memref<2x!tpu.dma_semaphore, #tpu.memory_space<semaphore_mem>> -> memref<1x!tpu.dma_semaphore, #tpu.memory_space<semaphore_mem>>
      %113 = tpu.memref_squeeze %112 : memref<1x!tpu.dma_semaphore, #tpu.memory_space<semaphore_mem>> -> memref<!tpu.dma_semaphore, #tpu.memory_space<semaphore_mem>>
      tpu.enqueue_dma source(%109 : memref<128xf32, #tpu.memory_space<any>>) target(%111 : memref<128xf32, #tpu.memory_space<vmem>>) target_semaphore(%113 : memref<!tpu.dma_semaphore, #tpu.memory_space<semaphore_mem>>)
      %c4_i32_59 = arith.constant 4 : i32
      %114 = arith.addi %73, %c4_i32_59 : i32
      %c15_i32_60 = arith.constant 15 : i32
      %115 = arith.minsi %114, %c15_i32_60 : i32
      %116 = arith.index_cast %115 : i32 to index
      %117 = memref.load %arg1[%116] : memref<16xi32, #tpu.memory_space<smem>>
      %c4_i32_61 = arith.constant 4 : i32
      %c0_i32_62 = arith.constant 0 : i32
      %118 = tpu.memref_slice %arg2[%117, %c0_i32_62] : memref<1000x128xf32, #tpu.memory_space<any>> -> memref<1x128xf32, #tpu.memory_space<any>>
      %119 = tpu.memref_squeeze %118 : memref<1x128xf32, #tpu.memory_space<any>> -> memref<128xf32, #tpu.memory_space<any>>
      %c0_i32_63 = arith.constant 0 : i32
      %120 = tpu.memref_slice %arg4[%72, %c4_i32_61, %c0_i32_63] : memref<2x8x128xf32, #tpu.memory_space<vmem>> -> memref<1x1x128xf32, #tpu.memory_space<vmem>>
      %121 = tpu.memref_squeeze %120 : memref<1x1x128xf32, #tpu.memory_space<vmem>> -> memref<128xf32, #tpu.memory_space<vmem>>
      %122 = tpu.memref_slice %arg5[%72] : memref<2x!tpu.dma_semaphore, #tpu.memory_space<semaphore_mem>> -> memref<1x!tpu.dma_semaphore, #tpu.memory_space<semaphore_mem>>
      %123 = tpu.memref_squeeze %122 : memref<1x!tpu.dma_semaphore, #tpu.memory_space<semaphore_mem>> -> memref<!tpu.dma_semaphore, #tpu.memory_space<semaphore_mem>>
      tpu.enqueue_dma source(%119 : memref<128xf32, #tpu.memory_space<any>>) target(%121 : memref<128xf32, #tpu.memory_space<vmem>>) target_semaphore(%123 : memref<!tpu.dma_semaphore, #tpu.memory_space<semaphore_mem>>)
      %c5_i32_64 = arith.constant 5 : i32
      %124 = arith.addi %73, %c5_i32_64 : i32
      %c15_i32_65 = arith.constant 15 : i32
      %125 = arith.minsi %124, %c15_i32_65 : i32
      %126 = arith.index_cast %125 : i32 to index
      %127 = memref.load %arg1[%126] : memref<16xi32, #tpu.memory_space<smem>>
      %c5_i32_66 = arith.constant 5 : i32
      %c0_i32_67 = arith.constant 0 : i32
      %128 = tpu.memref_slice %arg2[%127, %c0_i32_67] : memref<1000x128xf32, #tpu.memory_space<any>> -> memref<1x128xf32, #tpu.memory_space<any>>
      %129 = tpu.memref_squeeze %128 : memref<1x128xf32, #tpu.memory_space<any>> -> memref<128xf32, #tpu.memory_space<any>>
      %c0_i32_68 = arith.constant 0 : i32
      %130 = tpu.memref_slice %arg4[%72, %c5_i32_66, %c0_i32_68] : memref<2x8x128xf32, #tpu.memory_space<vmem>> -> memref<1x1x128xf32, #tpu.memory_space<vmem>>
      %131 = tpu.memref_squeeze %130 : memref<1x1x128xf32, #tpu.memory_space<vmem>> -> memref<128xf32, #tpu.memory_space<vmem>>
      %132 = tpu.memref_slice %arg5[%72] : memref<2x!tpu.dma_semaphore, #tpu.memory_space<semaphore_mem>> -> memref<1x!tpu.dma_semaphore, #tpu.memory_space<semaphore_mem>>
      %133 = tpu.memref_squeeze %132 : memref<1x!tpu.dma_semaphore, #tpu.memory_space<semaphore_mem>> -> memref<!tpu.dma_semaphore, #tpu.memory_space<semaphore_mem>>
      tpu.enqueue_dma source(%129 : memref<128xf32, #tpu.memory_space<any>>) target(%131 : memref<128xf32, #tpu.memory_space<vmem>>) target_semaphore(%133 : memref<!tpu.dma_semaphore, #tpu.memory_space<semaphore_mem>>)
      %c6_i32_69 = arith.constant 6 : i32
      %134 = arith.addi %73, %c6_i32_69 : i32
      %c15_i32_70 = arith.constant 15 : i32
      %135 = arith.minsi %134, %c15_i32_70 : i32
      %136 = arith.index_cast %135 : i32 to index
      %137 = memref.load %arg1[%136] : memref<16xi32, #tpu.memory_space<smem>>
      %c6_i32_71 = arith.constant 6 : i32
      %c0_i32_72 = arith.constant 0 : i32
      %138 = tpu.memref_slice %arg2[%137, %c0_i32_72] : memref<1000x128xf32, #tpu.memory_space<any>> -> memref<1x128xf32, #tpu.memory_space<any>>
      %139 = tpu.memref_squeeze %138 : memref<1x128xf32, #tpu.memory_space<any>> -> memref<128xf32, #tpu.memory_space<any>>
      %c0_i32_73 = arith.constant 0 : i32
      %140 = tpu.memref_slice %arg4[%72, %c6_i32_71, %c0_i32_73] : memref<2x8x128xf32, #tpu.memory_space<vmem>> -> memref<1x1x128xf32, #tpu.memory_space<vmem>>
      %141 = tpu.memref_squeeze %140 : memref<1x1x128xf32, #tpu.memory_space<vmem>> -> memref<128xf32, #tpu.memory_space<vmem>>
      %142 = tpu.memref_slice %arg5[%72] : memref<2x!tpu.dma_semaphore, #tpu.memory_space<semaphore_mem>> -> memref<1x!tpu.dma_semaphore, #tpu.memory_space<semaphore_mem>>
      %143 = tpu.memref_squeeze %142 : memref<1x!tpu.dma_semaphore, #tpu.memory_space<semaphore_mem>> -> memref<!tpu.dma_semaphore, #tpu.memory_space<semaphore_mem>>
      tpu.enqueue_dma source(%139 : memref<128xf32, #tpu.memory_space<any>>) target(%141 : memref<128xf32, #tpu.memory_space<vmem>>) target_semaphore(%143 : memref<!tpu.dma_semaphore, #tpu.memory_space<semaphore_mem>>)
      %c7_i32_74 = arith.constant 7 : i32
      %144 = arith.addi %73, %c7_i32_74 : i32
      %c15_i32_75 = arith.constant 15 : i32
      %145 = arith.minsi %144, %c15_i32_75 : i32
      %146 = arith.index_cast %145 : i32 to index
      %147 = memref.load %arg1[%146] : memref<16xi32, #tpu.memory_space<smem>>
      %c7_i32_76 = arith.constant 7 : i32
      %c0_i32_77 = arith.constant 0 : i32
      %148 = tpu.memref_slice %arg2[%147, %c0_i32_77] : memref<1000x128xf32, #tpu.memory_space<any>> -> memref<1x128xf32, #tpu.memory_space<any>>
      %149 = tpu.memref_squeeze %148 : memref<1x128xf32, #tpu.memory_space<any>> -> memref<128xf32, #tpu.memory_space<any>>
      %c0_i32_78 = arith.constant 0 : i32
      %150 = tpu.memref_slice %arg4[%72, %c7_i32_76, %c0_i32_78] : memref<2x8x128xf32, #tpu.memory_space<vmem>> -> memref<1x1x128xf32, #tpu.memory_space<vmem>>
      %151 = tpu.memref_squeeze %150 : memref<1x1x128xf32, #tpu.memory_space<vmem>> -> memref<128xf32, #tpu.memory_space<vmem>>
      %152 = tpu.memref_slice %arg5[%72] : memref<2x!tpu.dma_semaphore, #tpu.memory_space<semaphore_mem>> -> memref<1x!tpu.dma_semaphore, #tpu.memory_space<semaphore_mem>>
      %153 = tpu.memref_squeeze %152 : memref<1x!tpu.dma_semaphore, #tpu.memory_space<semaphore_mem>> -> memref<!tpu.dma_semaphore, #tpu.memory_space<semaphore_mem>>
      tpu.enqueue_dma source(%149 : memref<128xf32, #tpu.memory_space<any>>) target(%151 : memref<128xf32, #tpu.memory_space<vmem>>) target_semaphore(%153 : memref<!tpu.dma_semaphore, #tpu.memory_space<semaphore_mem>>)
    } else {
    }
    %c0_i32_8 = arith.constant 0 : i32
    %c0_i32_9 = arith.constant 0 : i32
    %c0_i32_10 = arith.constant 0 : i32
    %17 = tpu.memref_slice %arg2[%c0_i32_8, %c0_i32_10] : memref<1000x128xf32, #tpu.memory_space<any>> -> memref<1x128xf32, #tpu.memory_space<any>>
    %18 = tpu.memref_squeeze %17 : memref<1x128xf32, #tpu.memory_space<any>> -> memref<128xf32, #tpu.memory_space<any>>
    %c0_i32_11 = arith.constant 0 : i32
    %19 = tpu.memref_slice %arg4[%9, %c0_i32_9, %c0_i32_11] : memref<2x8x128xf32, #tpu.memory_space<vmem>> -> memref<1x1x128xf32, #tpu.memory_space<vmem>>
    %20 = tpu.memref_squeeze %19 : memref<1x1x128xf32, #tpu.memory_space<vmem>> -> memref<128xf32, #tpu.memory_space<vmem>>
    %21 = tpu.memref_slice %arg5[%9] : memref<2x!tpu.dma_semaphore, #tpu.memory_space<semaphore_mem>> -> memref<1x!tpu.dma_semaphore, #tpu.memory_space<semaphore_mem>>
    %22 = tpu.memref_squeeze %21 : memref<1x!tpu.dma_semaphore, #tpu.memory_space<semaphore_mem>> -> memref<!tpu.dma_semaphore, #tpu.memory_space<semaphore_mem>>
    tpu.wait_dma2 semaphore(%22 : memref<!tpu.dma_semaphore, #tpu.memory_space<semaphore_mem>>) src(%18 : memref<128xf32, #tpu.memory_space<any>>) dst(%20 : memref<128xf32, #tpu.memory_space<vmem>>)
    %c0_i32_12 = arith.constant 0 : i32
    %c1_i32_13 = arith.constant 1 : i32
    %c0_i32_14 = arith.constant 0 : i32
    %23 = tpu.memref_slice %arg2[%c0_i32_12, %c0_i32_14] : memref<1000x128xf32, #tpu.memory_space<any>> -> memref<1x128xf32, #tpu.memory_space<any>>
    %24 = tpu.memref_squeeze %23 : memref<1x128xf32, #tpu.memory_space<any>> -> memref<128xf32, #tpu.memory_space<any>>
    %c0_i32_15 = arith.constant 0 : i32
    %25 = tpu.memref_slice %arg4[%9, %c1_i32_13, %c0_i32_15] : memref<2x8x128xf32, #tpu.memory_space<vmem>> -> memref<1x1x128xf32, #tpu.memory_space<vmem>>
    %26 = tpu.memref_squeeze %25 : memref<1x1x128xf32, #tpu.memory_space<vmem>> -> memref<128xf32, #tpu.memory_space<vmem>>
    %27 = tpu.memref_slice %arg5[%9] : memref<2x!tpu.dma_semaphore, #tpu.memory_space<semaphore_mem>> -> memref<1x!tpu.dma_semaphore, #tpu.memory_space<semaphore_mem>>
    %28 = tpu.memref_squeeze %27 : memref<1x!tpu.dma_semaphore, #tpu.memory_space<semaphore_mem>> -> memref<!tpu.dma_semaphore, #tpu.memory_space<semaphore_mem>>
    tpu.wait_dma2 semaphore(%28 : memref<!tpu.dma_semaphore, #tpu.memory_space<semaphore_mem>>) src(%24 : memref<128xf32, #tpu.memory_space<any>>) dst(%26 : memref<128xf32, #tpu.memory_space<vmem>>)
    %c0_i32_16 = arith.constant 0 : i32
    %c2_i32_17 = arith.constant 2 : i32
    %c0_i32_18 = arith.constant 0 : i32
    %29 = tpu.memref_slice %arg2[%c0_i32_16, %c0_i32_18] : memref<1000x128xf32, #tpu.memory_space<any>> -> memref<1x128xf32, #tpu.memory_space<any>>
    %30 = tpu.memref_squeeze %29 : memref<1x128xf32, #tpu.memory_space<any>> -> memref<128xf32, #tpu.memory_space<any>>
    %c0_i32_19 = arith.constant 0 : i32
    %31 = tpu.memref_slice %arg4[%9, %c2_i32_17, %c0_i32_19] : memref<2x8x128xf32, #tpu.memory_space<vmem>> -> memref<1x1x128xf32, #tpu.memory_space<vmem>>
    %32 = tpu.memref_squeeze %31 : memref<1x1x128xf32, #tpu.memory_space<vmem>> -> memref<128xf32, #tpu.memory_space<vmem>>
    %33 = tpu.memref_slice %arg5[%9] : memref<2x!tpu.dma_semaphore, #tpu.memory_space<semaphore_mem>> -> memref<1x!tpu.dma_semaphore, #tpu.memory_space<semaphore_mem>>
    %34 = tpu.memref_squeeze %33 : memref<1x!tpu.dma_semaphore, #tpu.memory_space<semaphore_mem>> -> memref<!tpu.dma_semaphore, #tpu.memory_space<semaphore_mem>>
    tpu.wait_dma2 semaphore(%34 : memref<!tpu.dma_semaphore, #tpu.memory_space<semaphore_mem>>) src(%30 : memref<128xf32, #tpu.memory_space<any>>) dst(%32 : memref<128xf32, #tpu.memory_space<vmem>>)
    %c0_i32_20 = arith.constant 0 : i32
    %c3_i32 = arith.constant 3 : i32
    %c0_i32_21 = arith.constant 0 : i32
    %35 = tpu.memref_slice %arg2[%c0_i32_20, %c0_i32_21] : memref<1000x128xf32, #tpu.memory_space<any>> -> memref<1x128xf32, #tpu.memory_space<any>>
    %36 = tpu.memref_squeeze %35 : memref<1x128xf32, #tpu.memory_space<any>> -> memref<128xf32, #tpu.memory_space<any>>
    %c0_i32_22 = arith.constant 0 : i32
    %37 = tpu.memref_slice %arg4[%9, %c3_i32, %c0_i32_22] : memref<2x8x128xf32, #tpu.memory_space<vmem>> -> memref<1x1x128xf32, #tpu.memory_space<vmem>>
    %38 = tpu.memref_squeeze %37 : memref<1x1x128xf32, #tpu.memory_space<vmem>> -> memref<128xf32, #tpu.memory_space<vmem>>
    %39 = tpu.memref_slice %arg5[%9] : memref<2x!tpu.dma_semaphore, #tpu.memory_space<semaphore_mem>> -> memref<1x!tpu.dma_semaphore, #tpu.memory_space<semaphore_mem>>
    %40 = tpu.memref_squeeze %39 : memref<1x!tpu.dma_semaphore, #tpu.memory_space<semaphore_mem>> -> memref<!tpu.dma_semaphore, #tpu.memory_space<semaphore_mem>>
    tpu.wait_dma2 semaphore(%40 : memref<!tpu.dma_semaphore, #tpu.memory_space<semaphore_mem>>) src(%36 : memref<128xf32, #tpu.memory_space<any>>) dst(%38 : memref<128xf32, #tpu.memory_space<vmem>>)
    %c0_i32_23 = arith.constant 0 : i32
    %c4_i32 = arith.constant 4 : i32
    %c0_i32_24 = arith.constant 0 : i32
    %41 = tpu.memref_slice %arg2[%c0_i32_23, %c0_i32_24] : memref<1000x128xf32, #tpu.memory_space<any>> -> memref<1x128xf32, #tpu.memory_space<any>>
    %42 = tpu.memref_squeeze %41 : memref<1x128xf32, #tpu.memory_space<any>> -> memref<128xf32, #tpu.memory_space<any>>
    %c0_i32_25 = arith.constant 0 : i32
    %43 = tpu.memref_slice %arg4[%9, %c4_i32, %c0_i32_25] : memref<2x8x128xf32, #tpu.memory_space<vmem>> -> memref<1x1x128xf32, #tpu.memory_space<vmem>>
    %44 = tpu.memref_squeeze %43 : memref<1x1x128xf32, #tpu.memory_space<vmem>> -> memref<128xf32, #tpu.memory_space<vmem>>
    %45 = tpu.memref_slice %arg5[%9] : memref<2x!tpu.dma_semaphore, #tpu.memory_space<semaphore_mem>> -> memref<1x!tpu.dma_semaphore, #tpu.memory_space<semaphore_mem>>
    %46 = tpu.memref_squeeze %45 : memref<1x!tpu.dma_semaphore, #tpu.memory_space<semaphore_mem>> -> memref<!tpu.dma_semaphore, #tpu.memory_space<semaphore_mem>>
    tpu.wait_dma2 semaphore(%46 : memref<!tpu.dma_semaphore, #tpu.memory_space<semaphore_mem>>) src(%42 : memref<128xf32, #tpu.memory_space<any>>) dst(%44 : memref<128xf32, #tpu.memory_space<vmem>>)
    %c0_i32_26 = arith.constant 0 : i32
    %c5_i32 = arith.constant 5 : i32
    %c0_i32_27 = arith.constant 0 : i32
    %47 = tpu.memref_slice %arg2[%c0_i32_26, %c0_i32_27] : memref<1000x128xf32, #tpu.memory_space<any>> -> memref<1x128xf32, #tpu.memory_space<any>>
    %48 = tpu.memref_squeeze %47 : memref<1x128xf32, #tpu.memory_space<any>> -> memref<128xf32, #tpu.memory_space<any>>
    %c0_i32_28 = arith.constant 0 : i32
    %49 = tpu.memref_slice %arg4[%9, %c5_i32, %c0_i32_28] : memref<2x8x128xf32, #tpu.memory_space<vmem>> -> memref<1x1x128xf32, #tpu.memory_space<vmem>>
    %50 = tpu.memref_squeeze %49 : memref<1x1x128xf32, #tpu.memory_space<vmem>> -> memref<128xf32, #tpu.memory_space<vmem>>
    %51 = tpu.memref_slice %arg5[%9] : memref<2x!tpu.dma_semaphore, #tpu.memory_space<semaphore_mem>> -> memref<1x!tpu.dma_semaphore, #tpu.memory_space<semaphore_mem>>
    %52 = tpu.memref_squeeze %51 : memref<1x!tpu.dma_semaphore, #tpu.memory_space<semaphore_mem>> -> memref<!tpu.dma_semaphore, #tpu.memory_space<semaphore_mem>>
    tpu.wait_dma2 semaphore(%52 : memref<!tpu.dma_semaphore, #tpu.memory_space<semaphore_mem>>) src(%48 : memref<128xf32, #tpu.memory_space<any>>) dst(%50 : memref<128xf32, #tpu.memory_space<vmem>>)
    %c0_i32_29 = arith.constant 0 : i32
    %c6_i32 = arith.constant 6 : i32
    %c0_i32_30 = arith.constant 0 : i32
    %53 = tpu.memref_slice %arg2[%c0_i32_29, %c0_i32_30] : memref<1000x128xf32, #tpu.memory_space<any>> -> memref<1x128xf32, #tpu.memory_space<any>>
    %54 = tpu.memref_squeeze %53 : memref<1x128xf32, #tpu.memory_space<any>> -> memref<128xf32, #tpu.memory_space<any>>
    %c0_i32_31 = arith.constant 0 : i32
    %55 = tpu.memref_slice %arg4[%9, %c6_i32, %c0_i32_31] : memref<2x8x128xf32, #tpu.memory_space<vmem>> -> memref<1x1x128xf32, #tpu.memory_space<vmem>>
    %56 = tpu.memref_squeeze %55 : memref<1x1x128xf32, #tpu.memory_space<vmem>> -> memref<128xf32, #tpu.memory_space<vmem>>
    %57 = tpu.memref_slice %arg5[%9] : memref<2x!tpu.dma_semaphore, #tpu.memory_space<semaphore_mem>> -> memref<1x!tpu.dma_semaphore, #tpu.memory_space<semaphore_mem>>
    %58 = tpu.memref_squeeze %57 : memref<1x!tpu.dma_semaphore, #tpu.memory_space<semaphore_mem>> -> memref<!tpu.dma_semaphore, #tpu.memory_space<semaphore_mem>>
    tpu.wait_dma2 semaphore(%58 : memref<!tpu.dma_semaphore, #tpu.memory_space<semaphore_mem>>) src(%54 : memref<128xf32, #tpu.memory_space<any>>) dst(%56 : memref<128xf32, #tpu.memory_space<vmem>>)
    %c0_i32_32 = arith.constant 0 : i32
    %c7_i32 = arith.constant 7 : i32
    %c0_i32_33 = arith.constant 0 : i32
    %59 = tpu.memref_slice %arg2[%c0_i32_32, %c0_i32_33] : memref<1000x128xf32, #tpu.memory_space<any>> -> memref<1x128xf32, #tpu.memory_space<any>>
    %60 = tpu.memref_squeeze %59 : memref<1x128xf32, #tpu.memory_space<any>> -> memref<128xf32, #tpu.memory_space<any>>
    %c0_i32_34 = arith.constant 0 : i32
    %61 = tpu.memref_slice %arg4[%9, %c7_i32, %c0_i32_34] : memref<2x8x128xf32, #tpu.memory_space<vmem>> -> memref<1x1x128xf32, #tpu.memory_space<vmem>>
    %62 = tpu.memref_squeeze %61 : memref<1x1x128xf32, #tpu.memory_space<vmem>> -> memref<128xf32, #tpu.memory_space<vmem>>
    %63 = tpu.memref_slice %arg5[%9] : memref<2x!tpu.dma_semaphore, #tpu.memory_space<semaphore_mem>> -> memref<1x!tpu.dma_semaphore, #tpu.memory_space<semaphore_mem>>
    %64 = tpu.memref_squeeze %63 : memref<1x!tpu.dma_semaphore, #tpu.memory_space<semaphore_mem>> -> memref<!tpu.dma_semaphore, #tpu.memory_space<semaphore_mem>>
    tpu.wait_dma2 semaphore(%64 : memref<!tpu.dma_semaphore, #tpu.memory_space<semaphore_mem>>) src(%60 : memref<128xf32, #tpu.memory_space<any>>) dst(%62 : memref<128xf32, #tpu.memory_space<vmem>>)
    %65 = arith.index_cast %9 : i32 to index
    %c0 = arith.constant 0 : index
    %c0_35 = arith.constant 0 : index
    %66 = vector.load %arg4[%65, %c0, %c0_35] : memref<2x8x128xf32, #tpu.memory_space<vmem>>, vector<1x8x128xf32>
    %67 = vector.shape_cast %66 : vector<1x8x128xf32> to vector<8x128xf32>
    %cst = arith.constant 11.3137083 : f32
    %68 = vector.broadcast %cst : f32 to vector<8x128xf32>
    %69 = arith.mulf %67, %68 : vector<8x128xf32>
    %c0_36 = arith.constant 0 : index
    %c0_37 = arith.constant 0 : index
    %70 = vector.load %arg3[%c0_36, %c0_37] : memref<8x128xf32, #tpu.memory_space<vmem>>, vector<8x128xf32>
    tpu.vector_store %arg3[%c0_36, %c0_37], %69 {strides = array<i32>} : memref<8x128xf32, #tpu.memory_space<vmem>>, vector<8x128xf32>,
    return
  }
  func.func @transform_1(%arg0: i32, %arg1: memref<16xi32, #tpu.memory_space<smem>>) -> (i32, i32) {
    %c0_i32 = arith.constant 0 : i32
    %c0_i32_0 = arith.constant 0 : i32
    return %arg0, %c0_i32 : i32, i32
  }
}

</mosaic_0001>

<bundles_post_ra>
// kernel: tpu_custom_call.1
= control target key start
LH: loop header
LB: loop body
LE: loop exit
PB: predicated region body
PF: predicated region fallthrough
CT: control target
= control target key end

     0   :  { %s1719_s0 = inlined_call_operand.hbm [shape: s32[16], index: 0, kind: input, shape index: {}]   ;;  %s1720_s1 = inlined_call_operand.hbm [shape: f32[1000,128], index: 1, kind: input, shape index: {}]   ;;  %s1721_s2 = inlined_call_operand.hbm [shape: f32[16,128], index: 2, kind: output, shape index: {}]  }
   0x1   :  { %s623_s11 = scalar_lea.hbm %s1719_s0, 16 }
   0x2   :  { %p624_p0 = scmp.ne.s32.totalorder %s1719_s0, %s623_s11  ;;  %p627_p1 = scmp.lt.u32.totalorder %s623_s11, %s1719_s0 }
   0x4   :  { %p629_p2 = pnand %p627_p1, %p624_p0 }
   0x6   :  { %632 = shalt.err (!%p629_p2)  }
   0x7   :  { %s1141_s16 = smov [#allocation5]  }
   0x8   :  { %8 = dma.hbm_to_smem %s1719_s0, 16, %s1141_s16, [#allocation4] }
   0x9   :  { %1121 = dma.done.wait [#allocation4], 16 }
   0xa   :  { %1122 = vsyncadd [#allocation4], 4294967280 }
   0xb   :  { %10 = sfence }
   0xc   :  { %11 = vsyncpa [#allocation7], 0 }
   0xd   :  { %13 = vsyncpa [#allocation7 + $0x1], 0  ;;  %s1178_s19 = smov 0   ;;  %s1180_s20 = smov 0  }
   0xe   :  { %s1182_s21 = smov 0  }
   0xf LB: > { %s497_s0 = sadd.s32 4294967295, %s1139_s21   ;;  %s1195_s22 = sadd.s32 1, %s1139_s21   ;;  %s1139_s21 = sphi %s1182_s21, %s1741_s21   ;;  %s1135_s20 = sphi %s1180_s20, %s1740_s20   ;;  %s1131_s19 = sphi %s1178_s19, %s1739_s19  }
  0x10   : > { %s22_s23 = ssub.s32 %s1139_s21, %s1195_s22  ;;  %s25_s24 = sadd.s32 1, %s1135_s20 }
  0x11   : > { %p23_p3 = scmp.eq.s32.totalorder %s22_s23, 0  ;;  %p498_p4 = scmp.ne.s32.totalorder %s22_s23, 0 }
  0x12   : > { %p29_p5 = scmp.eq.s32.totalorder %s1139_s21, 1  ;;  %p34_p6 = scmp.ne.s32.totalorder %s1135_s20, %s1131_s19 }
  0x13   : > { %s1204_s25 = scalar_select %p23_p3, %s1135_s20, %s25_s24  }
  0x14   : > { %p1206_p7 = por %p498_p4, %p29_p5  ;;  %p35_p8 = scmp.eq.s32.totalorder %s497_s0, 1 }
  0x15   : > { %1725 = sst [smem:[#allocation53_spill]] %s1204_s25  ;;  %p499_p10 = scmp.ge.s32.totalorder %s1139_s21, 2 }
  0x16   : > { %s1726_s26 = scalar_select %p1206_p7, 1, 0 }
  0x17   : > { %p1210_p9 = por %p35_p8, %p34_p6  ;;  %44 = sbr.rel (%p499_p10) target bundleno = 476 (0x1dc), region = 12 }
  0x18   : > { %s1723_s28 = sand.u32 (!%p499_p10), 1, %s1135_s20   ;;  %p587_p11 = scmp.eq.s32.totalorder (!%p499_p10), %s1139_s21, 0 }
  0x19   : > { %s1727_s27 = scalar_select %p1210_p9, 1, 0 }
  0x1a   : > { %s1218_s29 = sshll.u32 (!%p499_p10), %s1723_s28, 3  ;;  %s68_s30 = sld [smem:[#allocation5]] (!%p499_p10) }
  0x1b   : > { %1728 = sst [smem:[#allocation54_spill]] %s1727_s27  ;;  %s1142_s4 = smov (!%p499_p10), [#allocation2]  }
  0x1c   : > { %s1221_s3 = sld [smem:[#allocation5 + $0x1]] (!%p499_p10)  ;;  %s78_s5 = sshll.u32 (!%p499_p10), %s1142_s4, 4  ;;  %s1223_s5 = int_to_ptr.vmem [resolvable:$true] %s78_s5 }
  0x1d   : > { %s1143_s6 = smov (!%p499_p10), [#allocation2 + $0x1]   ;;  %s1227_s8 = sld [smem:[#allocation5 + $0x2]] (!%p499_p10) }
  0x1e   : > { %s93_s7 = sshll.u32 %s1143_s6, 4  ;;  %s1229_s9 = sld [smem:[#allocation5 + $0x3]]  ;;  %s1225_s7 = int_to_ptr.vmem [resolvable:$true] %s93_s7 }
  0x1f   : > { %s1144_s11 = smov [#allocation2 + $0x2]   ;;  %s1240_s23 = scalar_lea.hbm %s1720_s1, 16000 }
  0x20   : > { %s505_s10 = sshll.u32 %s68_s30, 4  ;;  %s108_s12 = sshll.u32 %s1144_s11, 4  ;;  %s1262_s12 = int_to_ptr.vmem [resolvable:$true] %s108_s12 }
  0x21   : > { %s70_s15 = scalar_lea.hbm %s1720_s1, %s505_s10 }
  0x22   : > { %s507_s16 = sshll.u32 %s1221_s3, 4  ;;  %s633_s17 = scalar_lea.hbm %s70_s15, 16 }
  0x23   : > { %p634_p12 = scmp.ne.s32.totalorder %s70_s15, %s633_s17  ;;  %p638_p1 = scmp.lt.u32.totalorder %s70_s15, %s1720_s1 }
  0x24   : > { %p639_p2 = scmp.lt.u32.totalorder %s1240_s23, %s633_s17  ;;  %p641_p4 = scmp.lt.u32.totalorder %s633_s17, %s70_s15 }
  0x25   : > { %p635_p13 = pnand %p634_p12, %p587_p11 }
  0x26   : > { %p640_p3 = por %p639_p2, %p638_p1 }
  0x27   : > { %p636_p0 = pneg %p635_p13 }
  0x28   : > { %p642_p5 = por %p641_p4, %p640_p3 }
  0x2a   : > { %p643_p6 = pnand %p642_p5, %p636_p0 }
  0x2c   : > { %646 = shalt.err (!%p643_p6)  }
  0x2d   : > { %s647_s30 = scalar_lea.vmem %s1223_s5, 16  ;;  %s1251_s3 = scalar_lea.vmem %s1223_s5, 256 }
  0x2e   : > { %p648_p8 = scmp.ne.s32.totalorder %s1223_s5, %s647_s30  ;;  %p654_p13 = scmp.lt.s32.totalorder %s1223_s5, %s1223_s5 }
  0x2f   : > { %p655_p1 = scmp.lt.s32.totalorder %s1251_s3, %s647_s30 }
  0x30   : > { %p649_p10 = pnand %p648_p8, %p587_p11 }
  0x31   : > { %p656_p2 = por %p655_p1, %p654_p13 }
  0x32   : > { %p650_p12 = pneg %p649_p10 }
  0x34   : > { %p657_p3 = pnand %p656_p2, %p650_p12 }
  0x36   : > { %660 = shalt.err (!%p657_p3)  }
  0x37   : > { %548 = dma.hbm_to_vmem [thread:$0]  (%p587_p11), %s70_s15, 16, %s1223_s5, [#allocation3] }
  0x38   : > { %s84_s11 = scalar_lea.hbm %s1720_s1, %s507_s16 }
  0x39   : > { %s661_s13 = scalar_lea.hbm %s84_s11, 16  ;;  %p666_p6 = scmp.lt.u32.totalorder %s84_s11, %s1720_s1 }
  0x3a   : > { %p662_p0 = scmp.ne.s32.totalorder %s84_s11, %s661_s13  ;;  %p667_p8 = scmp.lt.u32.totalorder %s1240_s23, %s661_s13 }
  0x3b   : > { %p669_p12 = scmp.lt.u32.totalorder %s661_s13, %s84_s11 }
  0x3c   : > { %p663_p4 = pnand %p662_p0, %p587_p11  ;;  %p668_p10 = por %p667_p8, %p666_p6 }
  0x3e   : > { %p664_p5 = pneg %p663_p4  ;;  %p670_p13 = por %p669_p12, %p668_p10 }
  0x40   : > { %p671_p1 = pnand %p670_p13, %p664_p5 }
  0x42   : > { %674 = shalt.err (!%p671_p1)  }
  0x43   : > { %s675_s15 = scalar_lea.vmem %s1225_s7, 16  ;;  %p682_p4 = scmp.lt.s32.totalorder %s1225_s7, %s1223_s5 }
  0x44   : > { %p676_p2 = scmp.ne.s32.totalorder %s1225_s7, %s675_s15  ;;  %p683_p9 = scmp.lt.s32.totalorder %s1251_s3, %s675_s15 }
  0x46   : > { %p677_p3 = pnand %p676_p2, %p587_p11  ;;  %p684_p7 = por %p683_p9, %p682_p4 }
  0x48   : > { %p678_p0 = pneg %p677_p3 }
  0x4a   : > { %p685_p6 = pnand %p684_p7, %p678_p0 }
  0x4c   : > { %688 = shalt.err (!%p685_p6)  }
  0x4d   : > { %549 = dma.hbm_to_vmem [thread:$0]  (%p587_p11), %s84_s11, 16, %s1225_s7, [#allocation3] }
  0x4e   : > { %s509_s16 = sshll.u32 %s1227_s8, 4  ;;  %s511_s18 = sshll.u32 %s1229_s9, 4 }
  0x4f   : > { %s99_s4 = scalar_lea.hbm %s1720_s1, %s509_s16  ;;  %s1288_s10 = scalar_lea.hbm %s1720_s1, %s511_s18 }
  0x50   : > { %s689_s13 = scalar_lea.hbm %s99_s4, 16  ;;  %p694_p8 = scmp.lt.u32.totalorder %s99_s4, %s1720_s1 }
  0x51   : > { %p690_p7 = scmp.ne.s32.totalorder %s99_s4, %s689_s13  ;;  %p695_p10 = scmp.lt.u32.totalorder %s1240_s23, %s689_s13 }
  0x52   : > { %p697_p13 = scmp.lt.u32.totalorder %s689_s13, %s99_s4 }
  0x53   : > { %p691_p9 = pnand %p690_p7, %p587_p11  ;;  %p696_p12 = por %p695_p10, %p694_p8 }
  0x55   : > { %p692_p5 = pneg %p691_p9  ;;  %p698_p1 = por %p697_p13, %p696_p12 }
  0x57   : > { %p699_p2 = pnand %p698_p1, %p692_p5 }
  0x59   : > { %702 = shalt.err (!%p699_p2)  }
  0x5a   : > { %s703_s7 = scalar_lea.vmem %s1262_s12, 16  ;;  %p710_p6 = scmp.lt.s32.totalorder %s1262_s12, %s1223_s5 }
  0x5b   : > { %p704_p3 = scmp.ne.s32.totalorder %s1262_s12, %s703_s7  ;;  %p711_p7 = scmp.lt.s32.totalorder %s1251_s3, %s703_s7 }
  0x5d   : > { %p705_p0 = pnand %p704_p3, %p587_p11  ;;  %p712_p9 = por %p711_p7, %p710_p6 }
  0x5f   : > { %p706_p4 = pneg %p705_p0 }
  0x61   : > { %p713_p8 = pnand %p712_p9, %p706_p4 }
  0x63   : > { %716 = shalt.err (!%p713_p8)  }
  0x64   : > { %550 = dma.hbm_to_vmem [thread:$0]  (%p587_p11), %s99_s4, 16, %s1262_s12, [#allocation3] }
  0x65   : > { %s1306_s8 = sld [smem:[#allocation5 + $0x4]]  ;;  %s1145_s9 = smov [#allocation2 + $0x3]  }
  0x66   : > { %s123_s11 = sshll.u32 %s1145_s9, 4  ;;  %s1146_s15 = smov [#allocation2 + $0x4]   ;;  %s124_s11 = int_to_ptr.vmem [resolvable:$true] %s123_s11 }
  0x67   : > { %s138_s16 = sshll.u32 %s1146_s15, 4  ;;  %s717_s18 = scalar_lea.hbm %s1288_s10, 16  ;;  %s139_s16 = int_to_ptr.vmem [resolvable:$true] %s138_s16 }
  0x68   : > { %p718_p5 = scmp.ne.s32.totalorder %s1288_s10, %s717_s18  ;;  %p722_p13 = scmp.lt.u32.totalorder %s1288_s10, %s1720_s1 }
  0x69   : > { %p723_p1 = scmp.lt.u32.totalorder %s1240_s23, %s717_s18  ;;  %p725_p3 = scmp.lt.u32.totalorder %s717_s18, %s1288_s10 }
  0x6a   : > { %p719_p10 = pnand %p718_p5, %p587_p11 }
  0x6b   : > { %p724_p2 = por %p723_p1, %p722_p13 }
  0x6c   : > { %p720_p12 = pneg %p719_p10 }
  0x6d   : > { %p726_p0 = por %p725_p3, %p724_p2 }
  0x6f   : > { %p727_p4 = pnand %p726_p0, %p720_p12 }
  0x71   : > { %730 = shalt.err (!%p727_p4)  }
  0x72   : > { %s731_s12 = scalar_lea.vmem %s124_s11, 16  ;;  %p738_p8 = scmp.lt.s32.totalorder %s124_s11, %s1223_s5 }
  0x73   : > { %p732_p6 = scmp.ne.s32.totalorder %s124_s11, %s731_s12  ;;  %p739_p5 = scmp.lt.s32.totalorder %s1251_s3, %s731_s12 }
  0x75   : > { %p733_p7 = pnand %p732_p6, %p587_p11  ;;  %p740_p10 = por %p739_p5, %p738_p8 }
  0x77   : > { %p734_p9 = pneg %p733_p7 }
  0x79   : > { %p741_p1 = pnand %p740_p10, %p734_p9 }
  0x7b   : > { %744 = shalt.err (!%p741_p1)  }
  0x7c   : > { %551 = dma.hbm_to_vmem [thread:$0]  (%p587_p11), %s1288_s10, 16, %s124_s11, [#allocation3] }
  0x7d   : > { %s1325_s4 = sld [smem:[#allocation5 + $0x5]]  ;;  %s1327_s30 = sld [smem:[#allocation5 + $0x6]] }
  0x7e   : > { %s513_s6 = sshll.u32 %s1306_s8, 4  ;;  %s1147_s13 = smov [#allocation2 + $0x5]  }
  0x7f   : > { %s153_s14 = sshll.u32 %s1147_s13, 4  ;;  %s129_s9 = scalar_lea.hbm %s1720_s1, %s513_s6  ;;  %s1333_s14 = int_to_ptr.vmem [resolvable:$true] %s153_s14 }
  0x80   : > { %s745_s15 = scalar_lea.hbm %s129_s9, 16  ;;  %p750_p3 = scmp.lt.u32.totalorder %s129_s9, %s1720_s1 }
  0x81   : > { %p746_p12 = scmp.ne.s32.totalorder %s129_s9, %s745_s15  ;;  %p751_p0 = scmp.lt.u32.totalorder %s1240_s23, %s745_s15 }
  0x82   : > { %p753_p6 = scmp.lt.u32.totalorder %s745_s15, %s129_s9 }
  0x83   : > { %p747_p13 = pnand %p746_p12, %p587_p11  ;;  %p752_p4 = por %p751_p0, %p750_p3 }
  0x85   : > { %p748_p2 = pneg %p747_p13  ;;  %p754_p7 = por %p753_p6, %p752_p4 }
  0x87   : > { %p755_p9 = pnand %p754_p7, %p748_p2 }
  0x89   : > { %758 = shalt.err (!%p755_p9)  }
  0x8a   : > { %s759_s8 = scalar_lea.vmem %s139_s16, 16  ;;  %p766_p1 = scmp.lt.s32.totalorder %s139_s16, %s1223_s5 }
  0x8b   : > { %p760_p8 = scmp.ne.s32.totalorder %s139_s16, %s759_s8  ;;  %p767_p12 = scmp.lt.s32.totalorder %s1251_s3, %s759_s8 }
  0x8d   : > { %p761_p5 = pnand %p760_p8, %p587_p11  ;;  %p768_p13 = por %p767_p12, %p766_p1 }
  0x8f   : > { %p762_p10 = pneg %p761_p5 }
  0x91   : > { %p769_p0 = pnand %p768_p13, %p762_p10 }
  0x93   : > { %772 = shalt.err (!%p769_p0)  }
  0x94   : > { %552 = dma.hbm_to_vmem [thread:$0]  (%p587_p11), %s129_s9, 16, %s139_s16, [#allocation3] }
  0x95   : > { %s1347_s18 = sld [smem:[#allocation5 + $0x7]]  ;;  %s515_s0 = sshll.u32 %s1325_s4, 4 }
  0x96   : > { %s1148_s24 = smov [#allocation2 + $0x6]   ;;  %s144_s17 = scalar_lea.hbm %s1720_s1, %s515_s0 }
  0x97   : > { %s168_s12 = sshll.u32 %s1148_s24, 4  ;;  %s517_s7 = sshll.u32 %s1327_s30, 4  ;;  %s169_s12 = int_to_ptr.vmem [resolvable:$true] %s168_s12 }
  0x98   : > { %s773_s15 = scalar_lea.hbm %s144_s17, 16  ;;  %p778_p6 = scmp.lt.u32.totalorder %s144_s17, %s1720_s1 }
  0x99   : > { %p774_p2 = scmp.ne.s32.totalorder %s144_s17, %s773_s15  ;;  %p779_p7 = scmp.lt.u32.totalorder %s1240_s23, %s773_s15 }
  0x9a   : > { %p781_p8 = scmp.lt.u32.totalorder %s773_s15, %s144_s17 }
  0x9b   : > { %p775_p3 = pnand %p774_p2, %p587_p11  ;;  %p780_p9 = por %p779_p7, %p778_p6 }
  0x9d   : > { %p776_p4 = pneg %p775_p3  ;;  %p782_p5 = por %p781_p8, %p780_p9 }
  0x9f   : > { %p783_p10 = pnand %p782_p5, %p776_p4 }
  0xa1   : > { %786 = shalt.err (!%p783_p10)  }
  0xa2   : > { %s787_s16 = scalar_lea.vmem %s1333_s14, 16  ;;  %p794_p0 = scmp.lt.s32.totalorder %s1333_s14, %s1223_s5 }
  0xa3   : > { %p788_p1 = scmp.ne.s32.totalorder %s1333_s14, %s787_s16  ;;  %p795_p2 = scmp.lt.s32.totalorder %s1251_s3, %s787_s16 }
  0xa5   : > { %p789_p12 = pnand %p788_p1, %p587_p11  ;;  %p796_p3 = por %p795_p2, %p794_p0 }
  0xa7   : > { %p790_p13 = pneg %p789_p12 }
  0xa9   : > { %p797_p6 = pnand %p796_p3, %p790_p13 }
  0xab   : > { %800 = shalt.err (!%p797_p6)  }
  0xac   : > { %553 = dma.hbm_to_vmem [thread:$0]  (%p587_p11), %s144_s17, 16, %s1333_s14, [#allocation3] }
  0xad   : > { %s159_s9 = scalar_lea.hbm %s1720_s1, %s517_s7 }
  0xae   : > { %s801_s8 = scalar_lea.hbm %s159_s9, 16  ;;  %p806_p8 = scmp.lt.u32.totalorder %s159_s9, %s1720_s1 }
  0xaf   : > { %p802_p4 = scmp.ne.s32.totalorder %s159_s9, %s801_s8  ;;  %p807_p5 = scmp.lt.u32.totalorder %s1240_s23, %s801_s8 }
  0xb0   : > { %p809_p1 = scmp.lt.u32.totalorder %s801_s8, %s159_s9 }
  0xb1   : > { %p803_p7 = pnand %p802_p4, %p587_p11  ;;  %p808_p10 = por %p807_p5, %p806_p8 }
  0xb3   : > { %p804_p9 = pneg %p803_p7  ;;  %p810_p12 = por %p809_p1, %p808_p10 }
  0xb5   : > { %p811_p13 = pnand %p810_p12, %p804_p9 }
  0xb7   : > { %814 = shalt.err (!%p811_p13)  }
  0xb8   : > { %s815_s14 = scalar_lea.vmem %s169_s12, 16  ;;  %p822_p6 = scmp.lt.s32.totalorder %s169_s12, %s1223_s5 }
  0xb9   : > { %p816_p0 = scmp.ne.s32.totalorder %s169_s12, %s815_s14  ;;  %p823_p4 = scmp.lt.s32.totalorder %s1251_s3, %s815_s14 }
  0xbb   : > { %p817_p2 = pnand %p816_p0, %p587_p11  ;;  %p824_p7 = por %p823_p4, %p822_p6 }
  0xbd   : > { %p818_p3 = pneg %p817_p2 }
  0xbf   : > { %p825_p5 = pnand %p824_p7, %p818_p3 }
  0xc1   : > { %828 = shalt.err (!%p825_p5)  }
  0xc2   : > { %554 = dma.hbm_to_vmem [thread:$0]  (%p587_p11), %s159_s9, 16, %s169_s12, [#allocation3] }
  0xc3   : > { %s519_s6 = sshll.u32 %s1347_s18, 4  ;;  %s1149_s15 = smov [#allocation2 + $0x7]  }
  0xc4   : > { %s174_s7 = scalar_lea.hbm %s1720_s1, %s519_s6  ;;  %s183_s10 = sshll.u32 %s1149_s15, 4  ;;  %s184_s10 = int_to_ptr.vmem [resolvable:$true] %s183_s10 }
  0xc5   : > { %s829_s11 = scalar_lea.hbm %s174_s7, 16  ;;  %p834_p12 = scmp.lt.u32.totalorder %s174_s7, %s1720_s1 }
  0xc6   : > { %p830_p8 = scmp.ne.s32.totalorder %s174_s7, %s829_s11  ;;  %p835_p13 = scmp.lt.u32.totalorder %s1240_s23, %s829_s11 }
  0xc7   : > { %p837_p2 = scmp.lt.u32.totalorder %s829_s11, %s174_s7 }
  0xc8   : > { %p831_p10 = pnand %p830_p8, %p587_p11  ;;  %p836_p0 = por %p835_p13, %p834_p12 }
  0xca   : > { %p832_p1 = pneg %p831_p10  ;;  %p838_p3 = por %p837_p2, %p836_p0 }
  0xcc   : > { %p839_p6 = pnand %p838_p3, %p832_p1 }
  0xce   : > { %842 = shalt.err (!%p839_p6)  }
  0xcf   : > { %s843_s18 = scalar_lea.vmem %s184_s10, 16  ;;  %p850_p8 = scmp.lt.s32.totalorder %s184_s10, %s1223_s5 }
  0xd0   : > { %p844_p4 = scmp.ne.s32.totalorder %s184_s10, %s843_s18  ;;  %p851_p10 = scmp.lt.s32.totalorder %s1251_s3, %s843_s18 }
  0xd2   : > { %p845_p7 = pnand %p844_p4, %p587_p11  ;;  %p852_p9 = por %p851_p10, %p850_p8 }
  0xd4   : > { %p846_p5 = pneg %p845_p7 }
  0xd6   : > { %p853_p12 = pnand %p852_p9, %p846_p5 }
  0xd8   : > { %856 = shalt.err (!%p853_p12)  }
  0xd9   : > { %555 = dma.hbm_to_vmem [thread:$0]  (%p587_p11), %s174_s7, 16, %s184_s10, [#allocation3] }
  0xda   : > { %s53_s12 = ssub.s32 0, %s1139_s21  ;;  %p588_p1 = scmp.lt.s32.totalorder %s1195_s22, 2 }
  0xdb   : > { %s501_s30 = smin.u32 %s1139_s21, %s53_s12  ;;  %s545_s8 = sshll.u32 %s1139_s21, 3 }
  0xdc   : > { %s55_s9 = sand.u32 1, %s501_s30   ;;  %s1406_s24 = sadd.s32 8, %s545_s8 }
  0xdd   : > { %s56_s0 = ssub.s32 0, %s55_s9  ;;  %p1729_p9 = scmp.lt.s32.totalorder %s1139_s21, 0 }
  0xde   : > { %p194_p13 = scmp.lt.s32.totalorder %s1406_s24, 15  ;;  %s213_s14 = sadd.s32 1, %s1406_s24 }
  0xdf   : > { %s1743_s0 = smov (!%p1729_p9, %s56_s0), %s55_s9  ;;  %p214_p11 = scmp.lt.s32.totalorder %s213_s14, 15 }
  0xe0   : > { %p503_p0 = scmp.lt.s32.totalorder %s1743_s0, 0  ;;  %s62_s6 = sadd.s32 2, %s1743_s0 }
  0xe1   : > { %s195_s13 = scalar_select %p194_p13, %s1406_s24, 15 }
  0xe2   : > { %s1745_s6 = smov (!%p503_p0, %s62_s6), %s1743_s0  ;;  %s1749_s14 = smov (!%p214_p11, %s213_s14), 15 }
  0xe3   : > { %s557_s17 = scalar_select %p588_p1, [#allocation5], [#allocation42] }
  0xe4   : > { %s192_s7 = ssub.s32 1, %s1745_s6  ;;  %s1747_s13 = smov (!%p588_p1, %s195_s13), 0 }
  0xe5   : > { %s523_s15 = sshll.u32 %s192_s7, 3  ;;  %s196_s10 = sld [smem:[%s557_s17 + %s1747_s13]] }
  0xe6   : > { %s1420_s11 = scalar_lea.vmem [#allocation2], %s523_s15  ;;  %s1751_s14 = smov (!%p588_p1, %s1749_s14), 0 }
  0xe7   : > { %s209_s16 = sshll.u32 %s1420_s11, 4  ;;  %s444_s4 = scalar_lea.vmem %s1420_s11, 1 [#allocation2]  ;;  %s1423_s16 = int_to_ptr.vmem [resolvable:$true] %s209_s16 }
  0xe8   : > { %s560_s18 = scalar_select %p588_p1, [#allocation5], [#allocation43] }
  0xe9   : > { %s228_s30 = sshll.u32 %s444_s4, 4  ;;  %s1435_s17 = scalar_lea.sflag [#allocation3], %s192_s7  ;;  %s1454_s30 = int_to_ptr.vmem [resolvable:$true] %s228_s30 }
  0xea   : > { %s1433_s13 = sld [smem:[%s560_s18 + %s1751_s14]] }
  0xeb   : > { %s522_s12 = sshll.u32 %s196_s10, 4 }
  0xec   : > { %s198_s0 = scalar_lea.hbm %s1720_s1, %s522_s12 }
  0xed   : > { %s857_s15 = scalar_lea.hbm %s198_s0, 16  ;;  %p862_p4 = scmp.lt.u32.totalorder %s198_s0, %s1720_s1 }
  0xee   : > { %p858_p2 = scmp.ne.s32.totalorder %s198_s0, %s857_s15  ;;  %p863_p7 = scmp.lt.u32.totalorder %s1240_s23, %s857_s15 }
  0xef   : > { %p865_p8 = scmp.lt.u32.totalorder %s857_s15, %s198_s0 }
  0xf0   : > { %p859_p3 = pnand %p858_p2, %p588_p1  ;;  %p864_p5 = por %p863_p7, %p862_p4 }
  0xf2   : > { %p860_p6 = pneg %p859_p3  ;;  %p866_p10 = por %p865_p8, %p864_p5 }
  0xf4   : > { %p867_p12 = pnand %p866_p10, %p860_p6 }
  0xf6   : > { %870 = shalt.err (!%p867_p12)  }
  0xf7   : > { %s871_s14 = scalar_lea.vmem %s1423_s16, 16  ;;  %p878_p11 = scmp.lt.s32.totalorder %s1423_s16, %s1223_s5 }
  0xf8   : > { %p872_p9 = scmp.ne.s32.totalorder %s1423_s16, %s871_s14  ;;  %p879_p2 = scmp.lt.s32.totalorder %s1251_s3, %s871_s14 }
  0xfa   : > { %p873_p13 = pnand %p872_p9, %p588_p1  ;;  %p880_p3 = por %p879_p2, %p878_p11 }
  0xfc   : > { %p874_p0 = pneg %p873_p13 }
  0xfe   : > { %p881_p4 = pnand %p880_p3, %p874_p0 }
 0x100   : > { %884 = shalt.err (!%p881_p4)  }
 0x101   : > { %559 = dma.hbm_to_vmem [thread:$0]  (%p588_p1), %s198_s0, 16, %s1423_s16, %s1435_s17 }
 0x102   : > { %s232_s25 = sadd.s32 2, %s1406_s24  ;;  %s449_s28 = scalar_lea.vmem %s1420_s11, 2 [#allocation2] }
 0x103   : > { %p233_p6 = scmp.lt.s32.totalorder %s232_s25, 15  ;;  %s524_s10 = sshll.u32 %s1433_s13, 4 }
 0x104   : > { %s1460_s7 = scalar_select %p588_p1, [#allocation5], [#allocation44] }
 0x105   : > { %s1753_s25 = smov (!%p233_p6, %s232_s25), 15  ;;  %s247_s4 = sshll.u32 %s449_s28, 4  ;;  %s1466_s4 = int_to_ptr.vmem [resolvable:$true] %s247_s4 }
 0x106   : > { %s218_s9 = scalar_lea.hbm %s1720_s1, %s524_s10 }
 0x107   : > { %s885_s8 = scalar_lea.hbm %s218_s9, 16  ;;  %p890_p10 = scmp.lt.u32.totalorder %s218_s9, %s1720_s1 }
 0x108   : > { %p886_p7 = scmp.ne.s32.totalorder %s218_s9, %s885_s8  ;;  %p891_p12 = scmp.lt.u32.totalorder %s1240_s23, %s885_s8 }
 0x109   : > { %p893_p13 = scmp.lt.u32.totalorder %s885_s8, %s218_s9 }
 0x10a   : > { %p887_p5 = pnand %p886_p7, %p588_p1  ;;  %p892_p9 = por %p891_p12, %p890_p10 }
 0x10c   : > { %p888_p8 = pneg %p887_p5  ;;  %p894_p0 = por %p893_p13, %p892_p9 }
 0x10e   : > { %p895_p11 = pnand %p894_p0, %p888_p8 }
 0x110   : > { %898 = shalt.err (!%p895_p11)  }
 0x111   : > { %s899_s13 = scalar_lea.vmem %s1454_s30, 16  ;;  %p906_p6 = scmp.lt.s32.totalorder %s1454_s30, %s1223_s5 }
 0x112   : > { %p900_p2 = scmp.ne.s32.totalorder %s1454_s30, %s899_s13  ;;  %p907_p7 = scmp.lt.s32.totalorder %s1251_s3, %s899_s13 }
 0x114   : > { %p901_p3 = pnand %p900_p2, %p588_p1  ;;  %p908_p5 = por %p907_p7, %p906_p6 }
 0x116   : > { %p902_p4 = pneg %p901_p3 }
 0x118   : > { %p909_p10 = pnand %p908_p5, %p902_p4 }
 0x11a   : > { %912 = shalt.err (!%p909_p10)  }
 0x11b   : > { %562 = dma.hbm_to_vmem [thread:$0]  (%p588_p1), %s218_s9, 16, %s1454_s30, %s1435_s17 }
 0x11c   : > { %s1755_s25 = smov (!%p588_p1, %s1753_s25), 0  ;;  %s251_s15 = sadd.s32 3, %s1406_s24 }
 0x11d   : > { %s454_s14 = scalar_lea.vmem %s1420_s11, 3 [#allocation2]  ;;  %s235_s28 = sld [smem:[%s1460_s7 + %s1755_s25]] }
 0x11e   : > { %p252_p8 = scmp.lt.s32.totalorder %s251_s15, 15  ;;  %s266_s18 = sshll.u32 %s454_s14, 4  ;;  %s1495_s18 = int_to_ptr.vmem [resolvable:$true] %s266_s18 }
 0x11f   : > { %s566_s10 = scalar_select %p588_p1, [#allocation5], [#allocation45] }
 0x120   : > { %s1757_s15 = smov (!%p252_p8, %s251_s15), 15  ;;  %s270_s12 = sadd.s32 4, %s1406_s24 }
 0x121   : > { %s1759_s15 = smov (!%p588_p1, %s1757_s15), 0  ;;  %p1499_p12 = scmp.lt.s32.totalorder %s270_s12, 15 }
 0x122   : > { %s1503_s8 = sld [smem:[%s566_s10 + %s1759_s15]]  ;;  %s459_s0 = scalar_lea.vmem %s1420_s11, 4 [#allocation2] }
 0x123   : > { %s1730_s30 = scalar_select %p1499_p12, 1, 0 }
 0x124   : > { %s526_s9 = sshll.u32 %s235_s28, 4 }
 0x125   : > { %s237_s16 = scalar_lea.hbm %s1720_s1, %s526_s9 }
 0x126   : > { %s913_s13 = scalar_lea.hbm %s237_s16, 16  ;;  %p918_p11 = scmp.lt.u32.totalorder %s237_s16, %s1720_s1 }
 0x127   : > { %p914_p9 = scmp.ne.s32.totalorder %s237_s16, %s913_s13  ;;  %p919_p2 = scmp.lt.u32.totalorder %s1240_s23, %s913_s13 }
 0x128   : > { %p921_p4 = scmp.lt.u32.totalorder %s913_s13, %s237_s16 }
 0x129   : > { %p915_p13 = pnand %p914_p9, %p588_p1  ;;  %p920_p3 = por %p919_p2, %p918_p11 }
 0x12b   : > { %p916_p0 = pneg %p915_p13  ;;  %p922_p6 = por %p921_p4, %p920_p3 }
 0x12d   : > { %p923_p7 = pnand %p922_p6, %p916_p0 }
 0x12f   : > { %926 = shalt.err (!%p923_p7)  }
 0x130   : > { %s927_s15 = scalar_lea.vmem %s1466_s4, 16  ;;  %p934_p9 = scmp.lt.s32.totalorder %s1466_s4, %s1223_s5 }
 0x131   : > { %p928_p5 = scmp.ne.s32.totalorder %s1466_s4, %s927_s15  ;;  %p935_p13 = scmp.lt.s32.totalorder %s1251_s3, %s927_s15 }
 0x133   : > { %p929_p10 = pnand %p928_p5, %p588_p1  ;;  %p936_p12 = por %p935_p13, %p934_p9 }
 0x135   : > { %p930_p8 = pneg %p929_p10 }
 0x137   : > { %p937_p2 = pnand %p936_p12, %p930_p8 }
 0x139   : > { %940 = shalt.err (!%p937_p2)  }
 0x13a   : > { %565 = dma.hbm_to_vmem [thread:$0]  (%p588_p1), %s237_s16, 16, %s1466_s4, %s1435_s17 }
 0x13b   : > { %p1731_p0 = scmp.ne.s32.totalorder %s1730_s30, 0  ;;  %s528_s28 = sshll.u32 %s1503_s8, 4 }
 0x13c   : > { %s569_s27 = scalar_select %p588_p1, [#allocation5], [#allocation46] }
 0x13d   : > { %s1761_s12 = smov (!%p1731_p0, %s270_s12), 15  ;;  %s285_s10 = sshll.u32 %s459_s0, 4  ;;  %s1557_s10 = int_to_ptr.vmem [resolvable:$true] %s285_s10 }
 0x13e   : > { %s1763_s12 = smov (!%p588_p1, %s1761_s12), 0  ;;  %s256_s7 = scalar_lea.hbm %s1720_s1, %s528_s28 }
 0x13f   : > { %s1538_s13 = sld [smem:[%s569_s27 + %s1763_s12]]  ;;  %s941_s14 = scalar_lea.hbm %s256_s7, 16 }
 0x140   : > { %p942_p12 = scmp.ne.s32.totalorder %s256_s7, %s941_s14  ;;  %p946_p4 = scmp.lt.u32.totalorder %s256_s7, %s1720_s1 }
 0x141   : > { %p947_p6 = scmp.lt.u32.totalorder %s1240_s23, %s941_s14  ;;  %p949_p5 = scmp.lt.u32.totalorder %s941_s14, %s256_s7 }
 0x142   : > { %p943_p11 = pnand %p942_p12, %p588_p1 }
 0x143   : > { %p948_p7 = por %p947_p6, %p946_p4 }
 0x144   : > { %p944_p3 = pneg %p943_p11 }
 0x145   : > { %p950_p10 = por %p949_p5, %p948_p7 }
 0x147   : > { %p951_p8 = pnand %p950_p10, %p944_p3 }
 0x149   : > { %954 = shalt.err (!%p951_p8)  }
 0x14a   : > { %s955_s12 = scalar_lea.vmem %s1495_s18, 16  ;;  %p962_p0 = scmp.lt.s32.totalorder %s1495_s18, %s1223_s5 }
 0x14b   : > { %p956_p9 = scmp.ne.s32.totalorder %s1495_s18, %s955_s12  ;;  %p963_p12 = scmp.lt.s32.totalorder %s1251_s3, %s955_s12 }
 0x14d   : > { %p957_p13 = pnand %p956_p9, %p588_p1  ;;  %p964_p11 = por %p963_p12, %p962_p0 }
 0x14f   : > { %p958_p2 = pneg %p957_p13 }
 0x151   : > { %p965_p4 = pnand %p964_p11, %p958_p2 }
 0x153   : > { %968 = shalt.err (!%p965_p4)  }
 0x154   : > { %568 = dma.hbm_to_vmem [thread:$0]  (%p588_p1), %s256_s7, 16, %s1495_s18, %s1435_s17 }
 0x155   : > { %s289_s8 = sadd.s32 5, %s1406_s24  ;;  %s464_s16 = scalar_lea.vmem %s1420_s11, 5 [#allocation2] }
 0x156   : > { %p290_p3 = scmp.lt.s32.totalorder %s289_s8, 15  ;;  %s530_s15 = sshll.u32 %s1538_s13, 4 }
 0x157   : > { %s1563_s0 = scalar_select %p588_p1, [#allocation5], [#allocation47] }
 0x158   : > { %s1765_s8 = smov (!%p290_p3, %s289_s8), 15  ;;  %s275_s9 = scalar_lea.hbm %s1720_s1, %s530_s15 }
 0x159   : > { %s1569_s25 = sshll.u32 %s464_s16, 4  ;;  %s969_s14 = scalar_lea.hbm %s275_s9, 16  ;;  %s305_s25 = int_to_ptr.vmem [resolvable:$true] %s1569_s25 }
 0x15a   : > { %p970_p6 = scmp.ne.s32.totalorder %s275_s9, %s969_s14  ;;  %p974_p10 = scmp.lt.u32.totalorder %s275_s9, %s1720_s1 }
 0x15b   : > { %p975_p8 = scmp.lt.u32.totalorder %s1240_s23, %s969_s14  ;;  %p977_p13 = scmp.lt.u32.totalorder %s969_s14, %s275_s9 }
 0x15c   : > { %p971_p7 = pnand %p970_p6, %p588_p1 }
 0x15d   : > { %p976_p9 = por %p975_p8, %p974_p10 }
 0x15e   : > { %p972_p5 = pneg %p971_p7 }
 0x15f   : > { %p978_p2 = por %p977_p13, %p976_p9 }
 0x161   : > { %p979_p0 = pnand %p978_p2, %p972_p5 }
 0x163   : > { %982 = shalt.err (!%p979_p0)  }
 0x164   : > { %s983_s13 = scalar_lea.vmem %s1557_s10, 16  ;;  %p990_p3 = scmp.lt.s32.totalorder %s1557_s10, %s1223_s5 }
 0x165   : > { %p984_p12 = scmp.ne.s32.totalorder %s1557_s10, %s983_s13  ;;  %p991_p6 = scmp.lt.s32.totalorder %s1251_s3, %s983_s13 }
 0x167   : > { %p985_p11 = pnand %p984_p12, %p588_p1  ;;  %p992_p7 = por %p991_p6, %p990_p3 }
 0x169   : > { %p986_p4 = pneg %p985_p11 }
 0x16b   : > { %p993_p8 = pnand %p992_p7, %p986_p4 }
 0x16d   : > { %996 = shalt.err (!%p993_p8)  }
 0x16e   : > { %571 = dma.hbm_to_vmem [thread:$0]  (%p588_p1), %s275_s9, 16, %s1557_s10, %s1435_s17 }
 0x16f   : > { %s1767_s8 = smov (!%p588_p1, %s1765_s8), 0  ;;  %s308_s4 = sadd.s32 6, %s1406_s24 }
 0x170   : > { %s469_s30 = scalar_lea.vmem %s1420_s11, 6 [#allocation2]  ;;  %s292_s12 = sld [smem:[%s1563_s0 + %s1767_s8]] }
 0x171   : > { %p309_p5 = scmp.lt.s32.totalorder %s308_s4, 15  ;;  %s323_s15 = sshll.u32 %s469_s30, 4  ;;  %s1610_s15 = int_to_ptr.vmem [resolvable:$true] %s323_s15 }
 0x172   : > { %s575_s16 = scalar_select %p588_p1, [#allocation5], [#allocation48] }
 0x173   : > { %s1769_s4 = smov (!%p309_p5, %s308_s4), 15  ;;  %s327_s27 = sadd.s32 7, %s1406_s24 }
 0x174   : > { %s1771_s4 = smov (!%p588_p1, %s1769_s4), 0  ;;  %p1601_p10 = scmp.lt.s32.totalorder %s327_s27, 15 }
 0x175   : > { %s1605_s9 = sld [smem:[%s575_s16 + %s1771_s4]] }
 0x176   : > { %s1732_s28 = scalar_select %p1601_p10, 1, 0 }
 0x177   : > { %s532_s10 = sshll.u32 %s292_s12, 4 }
 0x178   : > { %s294_s0 = scalar_lea.hbm %s1720_s1, %s532_s10 }
 0x179   : > { %s997_s18 = scalar_lea.hbm %s294_s0, 16  ;;  %p1002_p0 = scmp.lt.u32.totalorder %s294_s0, %s1720_s1 }
 0x17a   : > { %p998_p9 = scmp.ne.s32.totalorder %s294_s0, %s997_s18  ;;  %p1003_p12 = scmp.lt.u32.totalorder %s1240_s23, %s997_s18 }
 0x17b   : > { %p1005_p4 = scmp.lt.u32.totalorder %s997_s18, %s294_s0 }
 0x17c   : > { %p999_p13 = pnand %p998_p9, %p588_p1  ;;  %p1004_p11 = por %p1003_p12, %p1002_p0 }
 0x17e   : > { %p1000_p2 = pneg %p999_p13  ;;  %p1006_p3 = por %p1005_p4, %p1004_p11 }
 0x180   : > { %p1007_p6 = pnand %p1006_p3, %p1000_p2 }
 0x182   : > { %1010 = shalt.err (!%p1007_p6)  }
 0x183   : > { %s1011_s4 = scalar_lea.vmem %s305_s25, 16  ;;  %p1018_p9 = scmp.lt.s32.totalorder %s305_s25, %s1223_s5 }
 0x184   : > { %p1012_p7 = scmp.ne.s32.totalorder %s305_s25, %s1011_s4  ;;  %p1019_p13 = scmp.lt.s32.totalorder %s1251_s3, %s1011_s4 }
 0x186   : > { %p1013_p8 = pnand %p1012_p7, %p588_p1  ;;  %p1020_p10 = por %p1019_p13, %p1018_p9 }
 0x188   : > { %p1014_p5 = pneg %p1013_p8 }
 0x18a   : > { %p1021_p0 = pnand %p1020_p10, %p1014_p5 }
 0x18c   : > { %1024 = shalt.err (!%p1021_p0)  }
 0x18d   : > { %574 = dma.hbm_to_vmem [thread:$0]  (%p588_p1), %s294_s0, 16, %s305_s25, %s1435_s17 }
 0x18e   : > { %p1733_p2 = scmp.ne.s32.totalorder %s1732_s28, 0  ;;  %s534_s12 = sshll.u32 %s1605_s9, 4 }
 0x18f   : > { %s578_s30 = scalar_select %p588_p1, [#allocation5], [#allocation49] }
 0x190   : > { %s1773_s27 = smov (!%p1733_p2, %s327_s27), 15  ;;  %s474_s16 = scalar_lea.vmem %s1420_s11, 7 [#allocation2] }
 0x191   : > { %s1775_s27 = smov (!%p588_p1, %s1773_s27), 0  ;;  %s313_s8 = scalar_lea.hbm %s1720_s1, %s534_s12 }
 0x192   : > { %s330_s18 = sld [smem:[%s578_s30 + %s1775_s27]]  ;;  %s1025_s7 = scalar_lea.hbm %s313_s8, 16 }
 0x193   : > { %p1026_p10 = scmp.ne.s32.totalorder %s313_s8, %s1025_s7  ;;  %p1030_p4 = scmp.lt.u32.totalorder %s313_s8, %s1720_s1 }
 0x194   : > { %p1031_p3 = scmp.lt.u32.totalorder %s1240_s23, %s1025_s7  ;;  %p1033_p7 = scmp.lt.u32.totalorder %s1025_s7, %s313_s8 }
 0x195   : > { %p1027_p12 = pnand %p1026_p10, %p588_p1 }
 0x196   : > { %p1032_p6 = por %p1031_p3, %p1030_p4 }
 0x197   : > { %p1028_p11 = pneg %p1027_p12 }
 0x198   : > { %p1034_p8 = por %p1033_p7, %p1032_p6 }
 0x19a   : > { %p1035_p5 = pnand %p1034_p8, %p1028_p11 }
 0x19c   : > { %1038 = shalt.err (!%p1035_p5)  }
 0x19d   : > { %s1039_s11 = scalar_lea.vmem %s1610_s15, 16  ;;  %p1046_p2 = scmp.lt.s32.totalorder %s1610_s15, %s1223_s5 }
 0x19e   : > { %p1040_p9 = scmp.ne.s32.totalorder %s1610_s15, %s1039_s11  ;;  %p1047_p10 = scmp.lt.s32.totalorder %s1251_s3, %s1039_s11 }
 0x1a0   : > { %p1041_p13 = pnand %p1040_p9, %p588_p1  ;;  %p1048_p12 = por %p1047_p10, %p1046_p2 }
 0x1a2   : > { %p1042_p0 = pneg %p1041_p13 }
 0x1a4   : > { %p1049_p3 = pnand %p1048_p12, %p1042_p0 }
 0x1a6   : > { %1052 = shalt.err (!%p1049_p3)  }
 0x1a7   : > { %577 = dma.hbm_to_vmem [thread:$0]  (%p588_p1), %s313_s8, 16, %s1610_s15, %s1435_s17 }
 0x1a8   : > { %s342_s27 = sshll.u32 %s474_s16, 4  ;;  %s536_s28 = sshll.u32 %s330_s18, 4  ;;  %s343_s27 = int_to_ptr.vmem [resolvable:$true] %s342_s27 }
 0x1a9   : > { %s332_s13 = scalar_lea.hbm %s1720_s1, %s536_s28 }
 0x1aa   : > { %s1053_s4 = scalar_lea.hbm %s332_s13, 16  ;;  %p1058_p7 = scmp.lt.u32.totalorder %s332_s13, %s1720_s1 }
 0x1ab   : > { %p1054_p11 = scmp.ne.s32.totalorder %s332_s13, %s1053_s4  ;;  %p1059_p8 = scmp.lt.u32.totalorder %s1240_s23, %s1053_s4 }
 0x1ac   : > { %p1061_p9 = scmp.lt.u32.totalorder %s1053_s4, %s332_s13 }
 0x1ad   : > { %p1055_p4 = pnand %p1054_p11, %p588_p1  ;;  %p1060_p5 = por %p1059_p8, %p1058_p7 }
 0x1af   : > { %p1056_p6 = pneg %p1055_p4  ;;  %p1062_p13 = por %p1061_p9, %p1060_p5 }
 0x1b1   : > { %p1063_p0 = pnand %p1062_p13, %p1056_p6 }
 0x1b3   : > { %1066 = shalt.err (!%p1063_p0)  }
 0x1b4   : > { %s1067_s15 = scalar_lea.vmem %s343_s27, 16  ;;  %p1074_p3 = scmp.lt.s32.totalorder %s343_s27, %s1223_s5 }
 0x1b5   : > { %p1068_p2 = scmp.ne.s32.totalorder %s343_s27, %s1067_s15  ;;  %p1075_p11 = scmp.lt.s32.totalorder %s1251_s3, %s1067_s15 }
 0x1b7   : > { %p1069_p10 = pnand %p1068_p2, %p588_p1  ;;  %p1076_p4 = por %p1075_p11, %p1074_p3 }
 0x1b9   : > { %p1070_p12 = pneg %p1069_p10 }
 0x1bb   : > { %p1077_p7 = pnand %p1076_p4, %p1070_p12 }
 0x1bd   : > { %1080 = shalt.err (!%p1077_p7)  }
 0x1be   : > { %580 = dma.hbm_to_vmem [thread:$0]  (%p588_p1), %s332_s13, 16, %s343_s27, %s1435_s17 }
 0x1bf   : > { %s51_s23 = scalar_lea.vmem [#allocation6], %s1218_s29  ;;  %s346_s16 = scalar_lea.sflag [#allocation3], %s1745_s6 }
 0x1c0   : > { %1123 = dma.done.wait %s346_s16, 128 }
 0x1c1   : > { %1124 = vsyncadd %s346_s16, 4294967168  ;;  %s538_s10 = sshll.u32 %s1745_s6, 3  ;;  %s540_s5 = sshll.u32 %s1139_s21, 7 }
 0x1c2   : > { %s382_s3 = sshll.u32 %s51_s23, 4  ;;  %s364_s14 = scalar_lea.vmem [#allocation2], %s538_s10  ;;  %s1680_s3 = int_to_ptr.vmem [resolvable:$true] %s382_s3 }
 0x1c3   : > { %v365_v0 = vld [vmem:[%s364_s14] sm:$0xff]  ;;  %s1678_s7 = scalar_lea.hbm %s1721_s2, %s540_s5  ;;  %s1734_s29 = sand.u32 1, %s1135_s20  }
 0x1c4   : > { %v366_v1 = vmul.f32 11.313708, %v365_v0  ;;  %s369_s17 = scalar_lea.sflag [#allocation7], %s1734_s29  ;;  %s1081_s25 = scalar_lea.vmem %s1680_s3, 128 }
 0x1c5   : > { %p1082_p1 = scmp.ne.s32.totalorder %s1680_s3, %s1081_s25  ;;  %p1735_p6 = scmp.ne.s32.totalorder %s1726_s26, 0 }
 0x1c6   : > { %367 = vst [vmem:[%s51_s23] sm:$0xff] %v366_v1  ;;  %s1150_s6 = smov [#allocation6]  }
 0x1c7   : > { %p1083_p8 = pnand %p1082_p1, %p1735_p6  ;;  %s1085_s24 = sshll.u32 %s1150_s6, 4  ;;  %s1086_s24 = int_to_ptr.vmem [resolvable:$false] %s1085_s24 }
 0x1c8   : > { %s1087_s11 = scalar_lea.vmem %s1086_s24, 256  ;;  %p1088_p9 = scmp.lt.s32.totalorder %s1680_s3, %s1086_s24 }
 0x1c9   : > { %p1084_p5 = pneg %p1083_p8  ;;  %p1089_p13 = scmp.lt.s32.totalorder %s1087_s11, %s1081_s25 }
 0x1cb   : > { %p1090_p0 = por %p1089_p13, %p1088_p9 }
 0x1cd   : > { %p1091_p2 = pnand %p1090_p0, %p1084_p5 }
 0x1cf   : > { %1094 = shalt.err (!%p1091_p2)
}
 0x1d0   : > { %s1095_s27 = scalar_lea.hbm %s1678_s7, 128  ;;  %s1099_s0 = scalar_lea.hbm %s1721_s2, 256 }
 0x1d1   : > { %p1096_p10 = scmp.ne.s32.totalorder %s1678_s7, %s1095_s27  ;;  %p1100_p11 = scmp.lt.u32.totalorder %s1678_s7, %s1721_s2 }
 0x1d2   : > { %p1101_p4 = scmp.lt.u32.totalorder %s1099_s0, %s1095_s27  ;;  %p1103_p1 = scmp.lt.u32.totalorder %s1095_s27, %s1678_s7 }
 0x1d3   : > { %p1097_p12 = pnand %p1096_p10, %p1735_p6 }
 0x1d4   : > { %p1102_p7 = por %p1101_p4, %p1100_p11 }
 0x1d5   : > { %p1098_p3 = pneg %p1097_p12 }
 0x1d6   : > { %p1104_p8 = por %p1103_p1, %p1102_p7 }
 0x1d8   : > { %p1105_p5 = pnand %p1104_p8, %p1098_p3 }
 0x1da   : > { %1108 = shalt.err (!%p1105_p5)
}
 0x1db   : > { %581 = dma.vmem_to_hbm [thread:$0]  (%p1735_p6), %s1680_s3, 128, %s1678_s7, %s369_s17  }
 0x1dc PF: > { %s1736_s30 = sld [smem:[#allocation54_spill]]  ;;  %p589_p9 = scmp.ge.s32.totalorder %s1139_s21, 1 }
 0x1dd   : > { %s394_s12 = sand.u32 1, %s1131_s19  }
 0x1de   : > { %s395_s15 = scalar_lea.sflag [#allocation7], %s394_s12 }
 0x1e2   : > { %p1737_p13 = scmp.ne.s32.totalorder %s1736_s30, 0 }
 0x1e4   : > { %p584_p0 = pnand %p589_p9, %p1737_p13 }
 0x1e6   : > { %1126 = dma.done.wait (!%p584_p0), %s395_s15, 128  }
 0x1e7   : > { %1128 = vsyncadd (!%p584_p0), %s395_s15, 4294967168  ;;  %s1738_s23 = sld [smem:[#allocation53_spill]]  ;;  %p16_p2 = scmp.ge.s32.totalorder %s1195_s22, 3  }
 0x1e8   : > { %s1739_s19 = smov %s1135_s20  ;;  %s1741_s21 = smov %s1195_s22 }
 0x1e9   :  { %18 = sbr.rel (!%p16_p2) target bundleno = 15 (0xf), region = 151 }
 0x1ed   : > { %s1740_s20 = smov %s1738_s23 }
 0x1f0   :  { %400 = vsyncpa [#allocation7], 1 }
 0x1f1   :  { %402 = vsyncpa [#allocation7 + $0x1], 1 }
 0x1f2   :  { %403 = vsyncmov [#allocation3] }
 0x1f5   :  { %s404_s21 = vpop.sfrf %403 }
 0x1f6   :  { %p543_p6 = scmp.ne.s32.totalorder %s404_s21, 0 }
 0x1f8   :  { %408 = shalt.err (%p543_p6)  }
 0x1f9   :  { %410 = vsyncmov [#allocation3 + $0x1] }
 0x1fc   :  { %s411_s26 = vpop.sfrf %410 }
 0x1fd   :  { %p544_p10 = scmp.ne.s32.totalorder %s411_s26, 0 }
 0x1ff   :  { %415 = shalt.err (%p544_p10)  }

</bundles_post_ra>
